<compile_context>
chip_gen: v6e
topology: v6e:2x2x1
jax: 0.10.0
libtpu: 0.0.40
codegen_flags: <defaults>
</compile_context>

<pallas_src>
import jax
import jax.numpy as jnp
from jax.experimental import pallas as pl
from jax.experimental.pallas import tpu as pltpu


# ----------------------------------------------------------------------------
# Fused forward kernel (one batch tile of TB samples per grid step)
# ----------------------------------------------------------------------------
def _fused_kernel(x_ref, wb1_ref, b1_ref, t0a_ref, t1a_ref,
                  wb2_ref, b2_ref, t0b_ref, t1b_ref,
                  wf1_ref, bf1_ref, wf2_ref, bf2_ref, wo_ref, bo_ref,
                  o_ref):
    f32 = jnp.float32
    bf16 = jnp.bfloat16
    tb = x_ref.shape[1]                        # samples per tile (multiple of 16)

    # ---- conv1: single K=140 MXU matmul (kh folded into lanes via im2row) ----
    # rows = (oh, b), lanes of LHS = (kh*28 + w), lanes of result = (ow*6 + co)
    xs = x_ref[...].reshape(24 * tb, 140)                        # bf16
    y1 = jnp.dot(xs, wb1_ref[...], preferred_element_type=f32)   # [24*tb, 144]
    y1 = jnp.maximum(y1 + b1_ref[...], 0.0)

    # ---- maxpool 2x2/2: H via sublane max, W via one-hot lane-select matmuls ----
    r = y1.reshape(12, 2, tb, 144)
    y1p = jnp.maximum(r[:, 0], r[:, 1]).reshape(12 * tb, 144).astype(bf16)
    p1 = jnp.maximum(
        jnp.dot(y1p, t0a_ref[...], preferred_element_type=f32),
        jnp.dot(y1p, t1a_ref[...], preferred_element_type=f32))  # [12*tb, 72]
    p1 = p1.astype(bf16).reshape(12, tb, 72)                     # [h1, B, w1*6+c1]

    # ---- conv2: 5 banded matmuls, pure accumulation chain (MRB-friendly) ----
    y2 = jnp.dot(p1[0:8].reshape(8 * tb, 72), wb2_ref[0],
                 preferred_element_type=f32)
    for kh in range(1, 5):
        y2 = y2 + jnp.dot(p1[kh:kh + 8].reshape(8 * tb, 72), wb2_ref[kh],
                          preferred_element_type=f32)
    y2 = jnp.maximum(y2 + b2_ref[...], 0.0)                      # [8*tb, 96]

    # ---- maxpool 2x2/2 ----
    r2 = y2.reshape(4, 2, tb, 96)
    y2p = jnp.maximum(r2[:, 0], r2[:, 1]).reshape(4 * tb, 96).astype(bf16)
    p2 = jnp.maximum(
        jnp.dot(y2p, t0b_ref[...], preferred_element_type=f32),
        jnp.dot(y2p, t1b_ref[...], preferred_element_type=f32))  # [4*tb, 48]
    p2 = p2.astype(bf16).reshape(4, tb, 48)                      # [h2, B, w2*12+c]

    # ---- fc1 (PyTorch NCHW flatten folded into wf1) + fc2 + out ----
    h = jnp.dot(p2[0], wf1_ref[0], preferred_element_type=f32)
    for hh in range(1, 4):
        h = h + jnp.dot(p2[hh], wf1_ref[hh], preferred_element_type=f32)
    h = jnp.maximum(h + bf1_ref[...], 0.0).astype(bf16)                  # fc1+relu
    h = jnp.maximum(jnp.dot(h, wf2_ref[...], preferred_element_type=f32)
                    + bf2_ref[...], 0.0).astype(bf16)                    # fc2+relu
    # out weight zero-padded to 128 lanes -> lane-dense, unmasked full store.
    o_ref[...] = (jnp.dot(h, wo_ref[...], preferred_element_type=f32)
                  + bo_ref[...])


# ----------------------------------------------------------------------------
# One-time weight preparation (outside the jitted forward)
# ----------------------------------------------------------------------------
def prepare_params(params):
    f32 = jnp.float32
    bf16 = jnp.bfloat16
    w1 = params["conv1_w"].astype(f32)[:, 0]           # [6, 5, 5]
    b1 = params["conv1_b"].astype(f32)
    w2 = params["conv2_w"].astype(f32)                 # [12, 6, 5, 5]
    b2 = params["conv2_b"].astype(f32)

    # conv1 band, kh-stacked: Wb1[kh*28+w, ow*6+co] = w1[co, kh, w-ow], 0<=w-ow<5
    kh = jnp.arange(5)[:, None, None, None]
    w = jnp.arange(28)[None, :, None, None]
    ow = jnp.arange(24)[None, None, :, None]
    co = jnp.arange(6)[None, None, None, :]
    kw = w - ow
    vals = w1[co, kh, jnp.clip(kw, 0, 4)]               # [5, 28, 24, 6]
    wb1 = jnp.where((kw >= 0) & (kw < 5), vals, 0.0).reshape(140, 144).astype(bf16)
    b1t = jnp.tile(b1, 24).reshape(1, 144)              # f32 bias

    # pool1 lane selections (even / odd output columns) — exact 0/1 in bf16.
    n = jnp.arange(72)
    s0 = 12 * (n // 6) + (n % 6)
    t0a = jax.nn.one_hot(s0, 144, dtype=bf16).T          # [144, 72]
    t1a = jax.nn.one_hot(s0 + 6, 144, dtype=bf16).T

    # conv2 band: Wb2[kh, w1*6+c1, ow2*12+co2] = w2[co2, c1, kh, w1-ow2]
    kh2 = jnp.arange(5)[:, None, None, None, None]
    w1i = jnp.arange(12)[None, :, None, None, None]
    c1 = jnp.arange(6)[None, None, :, None, None]
    ow2 = jnp.arange(8)[None, None, None, :, None]
    co2 = jnp.arange(12)[None, None, None, None, :]
    kw2 = w1i - ow2
    vals2 = w2[co2, c1, kh2, jnp.clip(kw2, 0, 4)]        # [5, 12, 6, 8, 12]
    wb2 = jnp.where((kw2 >= 0) & (kw2 < 5), vals2, 0.0).reshape(5, 72, 96).astype(bf16)
    b2t = jnp.tile(b2, 8).reshape(1, 96)                 # f32 bias

    # pool2 lane selections
    n2 = jnp.arange(48)
    s2 = 24 * (n2 // 12) + (n2 % 12)
    t0b = jax.nn.one_hot(s2, 96, dtype=bf16).T           # [96, 48]
    t1b = jax.nn.one_hot(s2 + 12, 96, dtype=bf16).T

    # fc1 with the PyTorch (c, h, w) flatten order folded in:
    # Wf1[h, w*12+c, j] = fc1_w[j, c*16 + h*4 + w]
    fc1 = params["fc1_w"].astype(f32).reshape(120, 12, 4, 4)    # [j, c, h, w]
    wf1 = fc1.transpose(2, 3, 1, 0).reshape(4, 48, 120).astype(bf16)
    bf1 = params["fc1_b"].astype(f32).reshape(1, 120)
    wf2 = params["fc2_w"].astype(f32).T.astype(bf16)             # [120, 60]
    bf2 = params["fc2_b"].astype(f32).reshape(1, 60)
    # out weight/bias zero-padded to 128 lanes (lane-dense output slab).
    wo = jnp.zeros((60, 128), f32).at[:, :10].set(
        params["out_w"].astype(f32).T).astype(bf16)              # [60, 128]
    bo = jnp.zeros((1, 128), f32).at[0, :10].set(params["out_b"].astype(f32))

    return (wb1, b1t, t0a, t1a, wb2, b2t, t0b, t1b,
            wf1, bf1, wf2, bf2, wo, bo)


# ----------------------------------------------------------------------------
# Forward wrapper
# ----------------------------------------------------------------------------
def _round_up(n, m):
    return ((n + m - 1) // m) * m


def _const_map(ndim):
    return lambda i, _n=ndim: (0,) * _n


def _choose_tile(batch, tb_request):
    """Batch tile: multiple of 16 (bf16 sublane packing), clamped to the batch,
    and split so the 'parallel' grid has >= 2 steps when the batch allows it
    (keeps both v7x TensorCores busy)."""
    bp0 = _round_up(batch, 16)
    tb = max(16, (min(tb_request, bp0) // 16) * 16)
    if bp0 // tb < 2 and bp0 >= 32:
        tb = max(16, _round_up(bp0 // 2, 16))
    return tb


def fashion_mnist_forward(x_nchw, prepared, *, tb=128):
    B = x_nchw.shape[0]
    tb = _choose_tile(B, tb)
    bp = _round_up(B, tb)

    x = x_nchw.reshape(B, 28, 28).astype(jnp.float32)
    if bp != B:
        x = jnp.pad(x, ((0, bp - B), (0, 0), (0, 0)))
    # conv1 im2row: fold the 5 kh-shifted row slabs into the lane dim, plus the
    # (B,H,W)->(H,B,W) transpose and the f32->bf16 cast, into one XLA prep op.
    # x5[oh, b, kh*28 + w] = x[b, oh + kh, w]
    x5 = jnp.concatenate([x[:, kh:kh + 24, :] for kh in range(5)], axis=-1)
    x5 = jnp.transpose(x5, (1, 0, 2)).astype(jnp.bfloat16)       # [24, bp, 140]

    weight_specs = [pl.BlockSpec(a.shape, _const_map(a.ndim)) for a in prepared]

    out = pl.pallas_call(
        _fused_kernel,
        out_shape=jax.ShapeDtypeStruct((bp, 128), jnp.float32),
        grid=(bp // tb,),
        in_specs=[pl.BlockSpec((24, tb, 140), lambda i: (0, i, 0))] + weight_specs,
        out_specs=pl.BlockSpec((tb, 128), lambda i: (i, 0)),
        compiler_params=pltpu.CompilerParams(
            dimension_semantics=("parallel",),
            vmem_limit_bytes=48 * 1024 * 1024,
        ),
    )(x5, *prepared)
    # Padded batch rows carry garbage logits (bias through ReLU) — sliced off.
    return out[:B, :10]


# ----------------------------------------------------------------------------
# Parameters + pure-JAX reference (for correctness checking only)
# ----------------------------------------------------------------------------
def init_params(key):
    def uniform(key, shape, fan_in):
        bound = 1.0 / jnp.sqrt(float(fan_in))
        return jax.random.uniform(key, shape, jnp.float32, -bound, bound)

    ks = jax.random.split(key, 10)
    return {
        "conv1_w": uniform(ks[0], (6, 1, 5, 5), 1 * 5 * 5),
        "conv1_b": uniform(ks[1], (6,), 1 * 5 * 5),
        "conv2_w": uniform(ks[2], (12, 6, 5, 5), 6 * 5 * 5),
        "conv2_b": uniform(ks[3], (12,), 6 * 5 * 5),
        "fc1_w": uniform(ks[4], (120, 192), 192),
        "fc1_b": uniform(ks[5], (120,), 192),
        "fc2_w": uniform(ks[6], (60, 120), 120),
        "fc2_b": uniform(ks[7], (60,), 120),
        "out_w": uniform(ks[8], (10, 60), 60),
        "out_b": uniform(ks[9], (10,), 60),
    }


def reference_forward(x_nchw, params):
    def conv(t, w, b):
        y = jax.lax.conv_general_dilated(
            t, w, (1, 1), "VALID",
            dimension_numbers=("NCHW", "OIHW", "NCHW"))
        return y + b[None, :, None, None]

    def pool(t):
        return jax.lax.reduce_window(
            t, -jnp.inf, jax.lax.max, (1, 1, 2, 2), (1, 1, 2, 2), "VALID")

    t = jax.nn.relu(conv(x_nchw, params["conv1_w"], params["conv1_b"]))
    t = pool(t)
    t = jax.nn.relu(conv(t, params["conv2_w"], params["conv2_b"]))
    t = pool(t)
    t = t.reshape(t.shape[0], -1)
    t = jax.nn.relu(t @ params["fc1_w"].T + params["fc1_b"])
    t = jax.nn.relu(t @ params["fc2_w"].T + params["fc2_b"])
    return t @ params["out_w"].T + params["out_b"]


if __name__ == "__main__":
    key = jax.random.PRNGKey(0)
    k_x, k_p = jax.random.split(key)

    # FashionMNIST input: [B, 1, 28, 28] (28x28 forced by fc1 = 12*4*4).
    # Small batch -> adaptive tile (tb=16, grid of 2 'parallel' steps).
    B = 32
    x = jax.random.normal(k_x, (B, 1, 28, 28), dtype=jnp.float32)
    params = init_params(k_p)
    prepared = prepare_params(params)   # one-time weight prep (outside jit)

    fwd = jax.jit(fashion_mnist_forward)
    logits = jax.block_until_ready(fwd(x, prepared))

    ref = reference_forward(x, params)
    assert logits.shape == (B, 10), logits.shape
    assert bool(jnp.all(jnp.isfinite(logits)))
    # bf16 MXU operands with f32 accumulation -> loosened tolerance vs f32 ref.
    err = float(jnp.max(jnp.abs(logits - ref)))
    assert err < 5e-2, f"Pallas output mismatch vs reference (max abs err {err})"

    print("KERNEL_OK")
</pallas_src>

<mosaic_0001>
module attributes {stable_mosaic.version = 11 : i64} {
  func.func @_fused_kernel(%arg0: i32, %arg1: memref<24x16x140xbf16, #tpu.memory_space<vmem>>, %arg2: memref<140x144xbf16, #tpu.memory_space<vmem>>, %arg3: memref<1x144xf32, #tpu.memory_space<vmem>>, %arg4: memref<144x72xbf16, #tpu.memory_space<vmem>>, %arg5: memref<144x72xbf16, #tpu.memory_space<vmem>>, %arg6: memref<5x72x96xbf16, #tpu.memory_space<vmem>>, %arg7: memref<1x96xf32, #tpu.memory_space<vmem>>, %arg8: memref<96x48xbf16, #tpu.memory_space<vmem>>, %arg9: memref<96x48xbf16, #tpu.memory_space<vmem>>, %arg10: memref<4x48x120xbf16, #tpu.memory_space<vmem>>, %arg11: memref<1x120xf32, #tpu.memory_space<vmem>>, %arg12: memref<120x60xbf16, #tpu.memory_space<vmem>>, %arg13: memref<1x60xf32, #tpu.memory_space<vmem>>, %arg14: memref<60x128xbf16, #tpu.memory_space<vmem>>, %arg15: memref<1x128xf32, #tpu.memory_space<vmem>>, %arg16: memref<16x128xf32, #tpu.memory_space<vmem>>) attributes {dimension_semantics = [#tpu.dimension_semantics<parallel>], iteration_bounds = array<i64: 2>, scalar_prefetch = 0 : i64, scratch_operands = 0 : i64, tpu.core_type = #tpu.core_type<tc>, window_params = [{transform_indices = @transform_0, window_bounds = array<i64: 24, 16, 140>}, {pipeline_mode = #tpu.pipeline_mode<synchronous>, transform_indices = @transform_1, window_bounds = array<i64: 140, 144>}, {pipeline_mode = #tpu.pipeline_mode<synchronous>, transform_indices = @transform_2, window_bounds = array<i64: 1, 144>}, {pipeline_mode = #tpu.pipeline_mode<synchronous>, transform_indices = @transform_3, window_bounds = array<i64: 144, 72>}, {pipeline_mode = #tpu.pipeline_mode<synchronous>, transform_indices = @transform_4, window_bounds = array<i64: 144, 72>}, {pipeline_mode = #tpu.pipeline_mode<synchronous>, transform_indices = @transform_5, window_bounds = array<i64: 5, 72, 96>}, {pipeline_mode = #tpu.pipeline_mode<synchronous>, transform_indices = @transform_6, window_bounds = array<i64: 1, 96>}, {pipeline_mode = #tpu.pipeline_mode<synchronous>, transform_indices = @transform_7, window_bounds = array<i64: 96, 48>}, {pipeline_mode = #tpu.pipeline_mode<synchronous>, transform_indices = @transform_8, window_bounds = array<i64: 96, 48>}, {pipeline_mode = #tpu.pipeline_mode<synchronous>, transform_indices = @transform_9, window_bounds = array<i64: 4, 48, 120>}, {pipeline_mode = #tpu.pipeline_mode<synchronous>, transform_indices = @transform_10, window_bounds = array<i64: 1, 120>}, {pipeline_mode = #tpu.pipeline_mode<synchronous>, transform_indices = @transform_11, window_bounds = array<i64: 120, 60>}, {pipeline_mode = #tpu.pipeline_mode<synchronous>, transform_indices = @transform_12, window_bounds = array<i64: 1, 60>}, {pipeline_mode = #tpu.pipeline_mode<synchronous>, transform_indices = @transform_13, window_bounds = array<i64: 60, 128>}, {pipeline_mode = #tpu.pipeline_mode<synchronous>, transform_indices = @transform_14, window_bounds = array<i64: 1, 128>}, {transform_indices = @transform_15, window_bounds = array<i64: 16, 128>}]} {
    %c0 = arith.constant 0 : index
    %c0_0 = arith.constant 0 : index
    %c0_1 = arith.constant 0 : index
    %0 = vector.load %arg1[%c0, %c0_0, %c0_1] : memref<24x16x140xbf16, #tpu.memory_space<vmem>>, vector<24x16x140xbf16>
    %1 = vector.shape_cast %0 : vector<24x16x140xbf16> to vector<384x140xbf16>
    %c0_2 = arith.constant 0 : index
    %c0_3 = arith.constant 0 : index
    %2 = vector.load %arg2[%c0_2, %c0_3] : memref<140x144xbf16, #tpu.memory_space<vmem>>, vector<140x144xbf16>
    %cst = arith.constant dense<0.000000e+00> : vector<384x144xf32>
    %3 = tpu.matmul %1, %2, %cst {dimension_numbers = #tpu.dot_dimension_numbers<[1], [0], [0], [1], [0, 0, 1, 1], [], []>} : vector<384x140xbf16>, vector<140x144xbf16>, vector<384x144xf32> -> vector<384x144xf32>
    %c0_4 = arith.constant 0 : index
    %c0_5 = arith.constant 0 : index
    %4 = vector.load %arg3[%c0_4, %c0_5] : memref<1x144xf32, #tpu.memory_space<vmem>>, vector<1x144xf32>
    %5 = vector.broadcast %4 : vector<1x144xf32> to vector<384x144xf32>
    %6 = arith.addf %3, %5 : vector<384x144xf32>
    %cst_6 = arith.constant 0.000000e+00 : f32
    %7 = vector.broadcast %cst_6 : f32 to vector<384x144xf32>
    %8 = arith.maximumf %6, %7 : vector<384x144xf32>
    %9 = vector.shape_cast %8 : vector<384x144xf32> to vector<12x2x16x144xf32>
    %10 = vector.extract_strided_slice %9 {offsets = [0, 0, 0, 0], sizes = [12, 1, 16, 144], strides = [1, 1, 1, 1]} : vector<12x2x16x144xf32> to vector<12x1x16x144xf32>
    %11 = vector.shape_cast %10 : vector<12x1x16x144xf32> to vector<12x16x144xf32>
    %12 = vector.extract_strided_slice %9 {offsets = [0, 1, 0, 0], sizes = [12, 1, 16, 144], strides = [1, 1, 1, 1]} : vector<12x2x16x144xf32> to vector<12x1x16x144xf32>
    %13 = vector.shape_cast %12 : vector<12x1x16x144xf32> to vector<12x16x144xf32>
    %14 = arith.maximumf %11, %13 : vector<12x16x144xf32>
    %15 = vector.shape_cast %14 : vector<12x16x144xf32> to vector<192x144xf32>
    %16 = arith.truncf %15 : vector<192x144xf32> to vector<192x144xbf16>
    %c0_7 = arith.constant 0 : index
    %c0_8 = arith.constant 0 : index
    %17 = vector.load %arg4[%c0_7, %c0_8] : memref<144x72xbf16, #tpu.memory_space<vmem>>, vector<144x72xbf16>
    %cst_9 = arith.constant dense<0.000000e+00> : vector<192x72xf32>
    %18 = tpu.matmul %16, %17, %cst_9 {dimension_numbers = #tpu.dot_dimension_numbers<[1], [0], [0], [1], [0, 0, 1, 1], [], []>} : vector<192x144xbf16>, vector<144x72xbf16>, vector<192x72xf32> -> vector<192x72xf32>
    %c0_10 = arith.constant 0 : index
    %c0_11 = arith.constant 0 : index
    %19 = vector.load %arg5[%c0_10, %c0_11] : memref<144x72xbf16, #tpu.memory_space<vmem>>, vector<144x72xbf16>
    %cst_12 = arith.constant dense<0.000000e+00> : vector<192x72xf32>
    %20 = tpu.matmul %16, %19, %cst_12 {dimension_numbers = #tpu.dot_dimension_numbers<[1], [0], [0], [1], [0, 0, 1, 1], [], []>} : vector<192x144xbf16>, vector<144x72xbf16>, vector<192x72xf32> -> vector<192x72xf32>
    %21 = arith.maximumf %18, %20 : vector<192x72xf32>
    %22 = arith.truncf %21 : vector<192x72xf32> to vector<192x72xbf16>
    %23 = vector.shape_cast %22 : vector<192x72xbf16> to vector<12x16x72xbf16>
    %24 = vector.extract_strided_slice %23 {offsets = [0, 0, 0], sizes = [8, 16, 72], strides = [1, 1, 1]} : vector<12x16x72xbf16> to vector<8x16x72xbf16>
    %25 = vector.shape_cast %24 : vector<8x16x72xbf16> to vector<128x72xbf16>
    %c0_13 = arith.constant 0 : index
    %c0_14 = arith.constant 0 : index
    %c0_15 = arith.constant 0 : index
    %26 = vector.load %arg6[%c0_13, %c0_14, %c0_15] : memref<5x72x96xbf16, #tpu.memory_space<vmem>>, vector<1x72x96xbf16>
    %27 = vector.shape_cast %26 : vector<1x72x96xbf16> to vector<72x96xbf16>
    %cst_16 = arith.constant dense<0.000000e+00> : vector<128x96xf32>
    %28 = tpu.matmul %25, %27, %cst_16 {dimension_numbers = #tpu.dot_dimension_numbers<[1], [0], [0], [1], [0, 0, 1, 1], [], []>} : vector<128x72xbf16>, vector<72x96xbf16>, vector<128x96xf32> -> vector<128x96xf32>
    %29 = vector.extract_strided_slice %23 {offsets = [1, 0, 0], sizes = [8, 16, 72], strides = [1, 1, 1]} : vector<12x16x72xbf16> to vector<8x16x72xbf16>
    %30 = vector.shape_cast %29 : vector<8x16x72xbf16> to vector<128x72xbf16>
    %c1 = arith.constant 1 : index
    %c0_17 = arith.constant 0 : index
    %c0_18 = arith.constant 0 : index
    %31 = vector.load %arg6[%c1, %c0_17, %c0_18] : memref<5x72x96xbf16, #tpu.memory_space<vmem>>, vector<1x72x96xbf16>
    %32 = vector.shape_cast %31 : vector<1x72x96xbf16> to vector<72x96xbf16>
    %cst_19 = arith.constant dense<0.000000e+00> : vector<128x96xf32>
    %33 = tpu.matmul %30, %32, %cst_19 {dimension_numbers = #tpu.dot_dimension_numbers<[1], [0], [0], [1], [0, 0, 1, 1], [], []>} : vector<128x72xbf16>, vector<72x96xbf16>, vector<128x96xf32> -> vector<128x96xf32>
    %34 = arith.addf %28, %33 : vector<128x96xf32>
    %35 = vector.extract_strided_slice %23 {offsets = [2, 0, 0], sizes = [8, 16, 72], strides = [1, 1, 1]} : vector<12x16x72xbf16> to vector<8x16x72xbf16>
    %36 = vector.shape_cast %35 : vector<8x16x72xbf16> to vector<128x72xbf16>
    %c2 = arith.constant 2 : index
    %c0_20 = arith.constant 0 : index
    %c0_21 = arith.constant 0 : index
    %37 = vector.load %arg6[%c2, %c0_20, %c0_21] : memref<5x72x96xbf16, #tpu.memory_space<vmem>>, vector<1x72x96xbf16>
    %38 = vector.shape_cast %37 : vector<1x72x96xbf16> to vector<72x96xbf16>
    %cst_22 = arith.constant dense<0.000000e+00> : vector<128x96xf32>
    %39 = tpu.matmul %36, %38, %cst_22 {dimension_numbers = #tpu.dot_dimension_numbers<[1], [0], [0], [1], [0, 0, 1, 1], [], []>} : vector<128x72xbf16>, vector<72x96xbf16>, vector<128x96xf32> -> vector<128x96xf32>
    %40 = arith.addf %34, %39 : vector<128x96xf32>
    %41 = vector.extract_strided_slice %23 {offsets = [3, 0, 0], sizes = [8, 16, 72], strides = [1, 1, 1]} : vector<12x16x72xbf16> to vector<8x16x72xbf16>
    %42 = vector.shape_cast %41 : vector<8x16x72xbf16> to vector<128x72xbf16>
    %c3 = arith.constant 3 : index
    %c0_23 = arith.constant 0 : index
    %c0_24 = arith.constant 0 : index
    %43 = vector.load %arg6[%c3, %c0_23, %c0_24] : memref<5x72x96xbf16, #tpu.memory_space<vmem>>, vector<1x72x96xbf16>
    %44 = vector.shape_cast %43 : vector<1x72x96xbf16> to vector<72x96xbf16>
    %cst_25 = arith.constant dense<0.000000e+00> : vector<128x96xf32>
    %45 = tpu.matmul %42, %44, %cst_25 {dimension_numbers = #tpu.dot_dimension_numbers<[1], [0], [0], [1], [0, 0, 1, 1], [], []>} : vector<128x72xbf16>, vector<72x96xbf16>, vector<128x96xf32> -> vector<128x96xf32>
    %46 = arith.addf %40, %45 : vector<128x96xf32>
    %47 = vector.extract_strided_slice %23 {offsets = [4, 0, 0], sizes = [8, 16, 72], strides = [1, 1, 1]} : vector<12x16x72xbf16> to vector<8x16x72xbf16>
    %48 = vector.shape_cast %47 : vector<8x16x72xbf16> to vector<128x72xbf16>
    %c4 = arith.constant 4 : index
    %c0_26 = arith.constant 0 : index
    %c0_27 = arith.constant 0 : index
    %49 = vector.load %arg6[%c4, %c0_26, %c0_27] : memref<5x72x96xbf16, #tpu.memory_space<vmem>>, vector<1x72x96xbf16>
    %50 = vector.shape_cast %49 : vector<1x72x96xbf16> to vector<72x96xbf16>
    %cst_28 = arith.constant dense<0.000000e+00> : vector<128x96xf32>
    %51 = tpu.matmul %48, %50, %cst_28 {dimension_numbers = #tpu.dot_dimension_numbers<[1], [0], [0], [1], [0, 0, 1, 1], [], []>} : vector<128x72xbf16>, vector<72x96xbf16>, vector<128x96xf32> -> vector<128x96xf32>
    %52 = arith.addf %46, %51 : vector<128x96xf32>
    %c0_29 = arith.constant 0 : index
    %c0_30 = arith.constant 0 : index
    %53 = vector.load %arg7[%c0_29, %c0_30] : memref<1x96xf32, #tpu.memory_space<vmem>>, vector<1x96xf32>
    %54 = vector.broadcast %53 : vector<1x96xf32> to vector<128x96xf32>
    %55 = arith.addf %52, %54 : vector<128x96xf32>
    %cst_31 = arith.constant 0.000000e+00 : f32
    %56 = vector.broadcast %cst_31 : f32 to vector<128x96xf32>
    %57 = arith.maximumf %55, %56 : vector<128x96xf32>
    %58 = vector.shape_cast %57 : vector<128x96xf32> to vector<4x2x16x96xf32>
    %59 = vector.extract_strided_slice %58 {offsets = [0, 0, 0, 0], sizes = [4, 1, 16, 96], strides = [1, 1, 1, 1]} : vector<4x2x16x96xf32> to vector<4x1x16x96xf32>
    %60 = vector.shape_cast %59 : vector<4x1x16x96xf32> to vector<4x16x96xf32>
    %61 = vector.extract_strided_slice %58 {offsets = [0, 1, 0, 0], sizes = [4, 1, 16, 96], strides = [1, 1, 1, 1]} : vector<4x2x16x96xf32> to vector<4x1x16x96xf32>
    %62 = vector.shape_cast %61 : vector<4x1x16x96xf32> to vector<4x16x96xf32>
    %63 = arith.maximumf %60, %62 : vector<4x16x96xf32>
    %64 = vector.shape_cast %63 : vector<4x16x96xf32> to vector<64x96xf32>
    %65 = arith.truncf %64 : vector<64x96xf32> to vector<64x96xbf16>
    %c0_32 = arith.constant 0 : index
    %c0_33 = arith.constant 0 : index
    %66 = vector.load %arg8[%c0_32, %c0_33] : memref<96x48xbf16, #tpu.memory_space<vmem>>, vector<96x48xbf16>
    %cst_34 = arith.constant dense<0.000000e+00> : vector<64x48xf32>
    %67 = tpu.matmul %65, %66, %cst_34 {dimension_numbers = #tpu.dot_dimension_numbers<[1], [0], [0], [1], [0, 0, 1, 1], [], []>} : vector<64x96xbf16>, vector<96x48xbf16>, vector<64x48xf32> -> vector<64x48xf32>
    %c0_35 = arith.constant 0 : index
    %c0_36 = arith.constant 0 : index
    %68 = vector.load %arg9[%c0_35, %c0_36] : memref<96x48xbf16, #tpu.memory_space<vmem>>, vector<96x48xbf16>
    %cst_37 = arith.constant dense<0.000000e+00> : vector<64x48xf32>
    %69 = tpu.matmul %65, %68, %cst_37 {dimension_numbers = #tpu.dot_dimension_numbers<[1], [0], [0], [1], [0, 0, 1, 1], [], []>} : vector<64x96xbf16>, vector<96x48xbf16>, vector<64x48xf32> -> vector<64x48xf32>
    %70 = arith.maximumf %67, %69 : vector<64x48xf32>
    %71 = arith.truncf %70 : vector<64x48xf32> to vector<64x48xbf16>
    %72 = vector.shape_cast %71 : vector<64x48xbf16> to vector<4x16x48xbf16>
    %73 = vector.extract_strided_slice %72 {offsets = [0, 0, 0], sizes = [1, 16, 48], strides = [1, 1, 1]} : vector<4x16x48xbf16> to vector<1x16x48xbf16>
    %74 = vector.shape_cast %73 : vector<1x16x48xbf16> to vector<16x48xbf16>
    %c0_38 = arith.constant 0 : index
    %c0_39 = arith.constant 0 : index
    %c0_40 = arith.constant 0 : index
    %75 = vector.load %arg10[%c0_38, %c0_39, %c0_40] : memref<4x48x120xbf16, #tpu.memory_space<vmem>>, vector<1x48x120xbf16>
    %76 = vector.shape_cast %75 : vector<1x48x120xbf16> to vector<48x120xbf16>
    %cst_41 = arith.constant dense<0.000000e+00> : vector<16x120xf32>
    %77 = tpu.matmul %74, %76, %cst_41 {dimension_numbers = #tpu.dot_dimension_numbers<[1], [0], [0], [1], [0, 0, 1, 1], [], []>} : vector<16x48xbf16>, vector<48x120xbf16>, vector<16x120xf32> -> vector<16x120xf32>
    %78 = vector.extract_strided_slice %72 {offsets = [1, 0, 0], sizes = [1, 16, 48], strides = [1, 1, 1]} : vector<4x16x48xbf16> to vector<1x16x48xbf16>
    %79 = vector.shape_cast %78 : vector<1x16x48xbf16> to vector<16x48xbf16>
    %c1_42 = arith.constant 1 : index
    %c0_43 = arith.constant 0 : index
    %c0_44 = arith.constant 0 : index
    %80 = vector.load %arg10[%c1_42, %c0_43, %c0_44] : memref<4x48x120xbf16, #tpu.memory_space<vmem>>, vector<1x48x120xbf16>
    %81 = vector.shape_cast %80 : vector<1x48x120xbf16> to vector<48x120xbf16>
    %cst_45 = arith.constant dense<0.000000e+00> : vector<16x120xf32>
    %82 = tpu.matmul %79, %81, %cst_45 {dimension_numbers = #tpu.dot_dimension_numbers<[1], [0], [0], [1], [0, 0, 1, 1], [], []>} : vector<16x48xbf16>, vector<48x120xbf16>, vector<16x120xf32> -> vector<16x120xf32>
    %83 = arith.addf %77, %82 : vector<16x120xf32>
    %84 = vector.extract_strided_slice %72 {offsets = [2, 0, 0], sizes = [1, 16, 48], strides = [1, 1, 1]} : vector<4x16x48xbf16> to vector<1x16x48xbf16>
    %85 = vector.shape_cast %84 : vector<1x16x48xbf16> to vector<16x48xbf16>
    %c2_46 = arith.constant 2 : index
    %c0_47 = arith.constant 0 : index
    %c0_48 = arith.constant 0 : index
    %86 = vector.load %arg10[%c2_46, %c0_47, %c0_48] : memref<4x48x120xbf16, #tpu.memory_space<vmem>>, vector<1x48x120xbf16>
    %87 = vector.shape_cast %86 : vector<1x48x120xbf16> to vector<48x120xbf16>
    %cst_49 = arith.constant dense<0.000000e+00> : vector<16x120xf32>
    %88 = tpu.matmul %85, %87, %cst_49 {dimension_numbers = #tpu.dot_dimension_numbers<[1], [0], [0], [1], [0, 0, 1, 1], [], []>} : vector<16x48xbf16>, vector<48x120xbf16>, vector<16x120xf32> -> vector<16x120xf32>
    %89 = arith.addf %83, %88 : vector<16x120xf32>
    %90 = vector.extract_strided_slice %72 {offsets = [3, 0, 0], sizes = [1, 16, 48], strides = [1, 1, 1]} : vector<4x16x48xbf16> to vector<1x16x48xbf16>
    %91 = vector.shape_cast %90 : vector<1x16x48xbf16> to vector<16x48xbf16>
    %c3_50 = arith.constant 3 : index
    %c0_51 = arith.constant 0 : index
    %c0_52 = arith.constant 0 : index
    %92 = vector.load %arg10[%c3_50, %c0_51, %c0_52] : memref<4x48x120xbf16, #tpu.memory_space<vmem>>, vector<1x48x120xbf16>
    %93 = vector.shape_cast %92 : vector<1x48x120xbf16> to vector<48x120xbf16>
    %cst_53 = arith.constant dense<0.000000e+00> : vector<16x120xf32>
    %94 = tpu.matmul %91, %93, %cst_53 {dimension_numbers = #tpu.dot_dimension_numbers<[1], [0], [0], [1], [0, 0, 1, 1], [], []>} : vector<16x48xbf16>, vector<48x120xbf16>, vector<16x120xf32> -> vector<16x120xf32>
    %95 = arith.addf %89, %94 : vector<16x120xf32>
    %c0_54 = arith.constant 0 : index
    %c0_55 = arith.constant 0 : index
    %96 = vector.load %arg11[%c0_54, %c0_55] : memref<1x120xf32, #tpu.memory_space<vmem>>, vector<1x120xf32>
    %97 = vector.broadcast %96 : vector<1x120xf32> to vector<16x120xf32>
    %98 = arith.addf %95, %97 : vector<16x120xf32>
    %cst_56 = arith.constant 0.000000e+00 : f32
    %99 = vector.broadcast %cst_56 : f32 to vector<16x120xf32>
    %100 = arith.maximumf %98, %99 : vector<16x120xf32>
    %101 = arith.truncf %100 : vector<16x120xf32> to vector<16x120xbf16>
    %c0_57 = arith.constant 0 : index
    %c0_58 = arith.constant 0 : index
    %102 = vector.load %arg12[%c0_57, %c0_58] : memref<120x60xbf16, #tpu.memory_space<vmem>>, vector<120x60xbf16>
    %cst_59 = arith.constant dense<0.000000e+00> : vector<16x60xf32>
    %103 = tpu.matmul %101, %102, %cst_59 {dimension_numbers = #tpu.dot_dimension_numbers<[1], [0], [0], [1], [0, 0, 1, 1], [], []>} : vector<16x120xbf16>, vector<120x60xbf16>, vector<16x60xf32> -> vector<16x60xf32>
    %c0_60 = arith.constant 0 : index
    %c0_61 = arith.constant 0 : index
    %104 = vector.load %arg13[%c0_60, %c0_61] : memref<1x60xf32, #tpu.memory_space<vmem>>, vector<1x60xf32>
    %105 = vector.broadcast %104 : vector<1x60xf32> to vector<16x60xf32>
    %106 = arith.addf %103, %105 : vector<16x60xf32>
    %cst_62 = arith.constant 0.000000e+00 : f32
    %107 = vector.broadcast %cst_62 : f32 to vector<16x60xf32>
    %108 = arith.maximumf %106, %107 : vector<16x60xf32>
    %109 = arith.truncf %108 : vector<16x60xf32> to vector<16x60xbf16>
    %c0_63 = arith.constant 0 : index
    %c0_64 = arith.constant 0 : index
    %110 = vector.load %arg14[%c0_63, %c0_64] : memref<60x128xbf16, #tpu.memory_space<vmem>>, vector<60x128xbf16>
    %cst_65 = arith.constant dense<0.000000e+00> : vector<16x128xf32>
    %111 = tpu.matmul %109, %110, %cst_65 {dimension_numbers = #tpu.dot_dimension_numbers<[1], [0], [0], [1], [0, 0, 1, 1], [], []>} : vector<16x60xbf16>, vector<60x128xbf16>, vector<16x128xf32> -> vector<16x128xf32>
    %c0_66 = arith.constant 0 : index
    %c0_67 = arith.constant 0 : index
    %112 = vector.load %arg15[%c0_66, %c0_67] : memref<1x128xf32, #tpu.memory_space<vmem>>, vector<1x128xf32>
    %113 = vector.broadcast %112 : vector<1x128xf32> to vector<16x128xf32>
    %114 = arith.addf %111, %113 : vector<16x128xf32>
    %c0_68 = arith.constant 0 : index
    %c0_69 = arith.constant 0 : index
    %115 = vector.load %arg16[%c0_68, %c0_69] : memref<16x128xf32, #tpu.memory_space<vmem>>, vector<16x128xf32>
    tpu.vector_store %arg16[%c0_68, %c0_69], %114 {strides = array<i32>} : memref<16x128xf32, #tpu.memory_space<vmem>>, vector<16x128xf32>,
    return
  }
  func.func @transform_0(%arg0: i32) -> (i32, i32, i32) {
    %c0_i32 = arith.constant 0 : i32
    %c0_i32_0 = arith.constant 0 : i32
    %c0_i32_1 = arith.constant 0 : i32
    return %c0_i32, %arg0, %c0_i32_0 : i32, i32, i32
  }
  func.func @transform_1(%arg0: i32) -> (i32, i32) {
    %c0_i32 = arith.constant 0 : i32
    %c0_i32_0 = arith.constant 0 : i32
    %c0_i32_1 = arith.constant 0 : i32
    return %c0_i32, %c0_i32_0 : i32, i32
  }
  func.func @transform_2(%arg0: i32) -> (i32, i32) {
    %c0_i32 = arith.constant 0 : i32
    %c0_i32_0 = arith.constant 0 : i32
    %c0_i32_1 = arith.constant 0 : i32
    return %c0_i32, %c0_i32_0 : i32, i32
  }
  func.func @transform_3(%arg0: i32) -> (i32, i32) {
    %c0_i32 = arith.constant 0 : i32
    %c0_i32_0 = arith.constant 0 : i32
    %c0_i32_1 = arith.constant 0 : i32
    return %c0_i32, %c0_i32_0 : i32, i32
  }
  func.func @transform_4(%arg0: i32) -> (i32, i32) {
    %c0_i32 = arith.constant 0 : i32
    %c0_i32_0 = arith.constant 0 : i32
    %c0_i32_1 = arith.constant 0 : i32
    return %c0_i32, %c0_i32_0 : i32, i32
  }
  func.func @transform_5(%arg0: i32) -> (i32, i32, i32) {
    %c0_i32 = arith.constant 0 : i32
    %c0_i32_0 = arith.constant 0 : i32
    %c0_i32_1 = arith.constant 0 : i32
    %c0_i32_2 = arith.constant 0 : i32
    return %c0_i32, %c0_i32_0, %c0_i32_1 : i32, i32, i32
  }
  func.func @transform_6(%arg0: i32) -> (i32, i32) {
    %c0_i32 = arith.constant 0 : i32
    %c0_i32_0 = arith.constant 0 : i32
    %c0_i32_1 = arith.constant 0 : i32
    return %c0_i32, %c0_i32_0 : i32, i32
  }
  func.func @transform_7(%arg0: i32) -> (i32, i32) {
    %c0_i32 = arith.constant 0 : i32
    %c0_i32_0 = arith.constant 0 : i32
    %c0_i32_1 = arith.constant 0 : i32
    return %c0_i32, %c0_i32_0 : i32, i32
  }
  func.func @transform_8(%arg0: i32) -> (i32, i32) {
    %c0_i32 = arith.constant 0 : i32
    %c0_i32_0 = arith.constant 0 : i32
    %c0_i32_1 = arith.constant 0 : i32
    return %c0_i32, %c0_i32_0 : i32, i32
  }
  func.func @transform_9(%arg0: i32) -> (i32, i32, i32) {
    %c0_i32 = arith.constant 0 : i32
    %c0_i32_0 = arith.constant 0 : i32
    %c0_i32_1 = arith.constant 0 : i32
    %c0_i32_2 = arith.constant 0 : i32
    return %c0_i32, %c0_i32_0, %c0_i32_1 : i32, i32, i32
  }
  func.func @transform_10(%arg0: i32) -> (i32, i32) {
    %c0_i32 = arith.constant 0 : i32
    %c0_i32_0 = arith.constant 0 : i32
    %c0_i32_1 = arith.constant 0 : i32
    return %c0_i32, %c0_i32_0 : i32, i32
  }
  func.func @transform_11(%arg0: i32) -> (i32, i32) {
    %c0_i32 = arith.constant 0 : i32
    %c0_i32_0 = arith.constant 0 : i32
    %c0_i32_1 = arith.constant 0 : i32
    return %c0_i32, %c0_i32_0 : i32, i32
  }
  func.func @transform_12(%arg0: i32) -> (i32, i32) {
    %c0_i32 = arith.constant 0 : i32
    %c0_i32_0 = arith.constant 0 : i32
    %c0_i32_1 = arith.constant 0 : i32
    return %c0_i32, %c0_i32_0 : i32, i32
  }
  func.func @transform_13(%arg0: i32) -> (i32, i32) {
    %c0_i32 = arith.constant 0 : i32
    %c0_i32_0 = arith.constant 0 : i32
    %c0_i32_1 = arith.constant 0 : i32
    return %c0_i32, %c0_i32_0 : i32, i32
  }
  func.func @transform_14(%arg0: i32) -> (i32, i32) {
    %c0_i32 = arith.constant 0 : i32
    %c0_i32_0 = arith.constant 0 : i32
    %c0_i32_1 = arith.constant 0 : i32
    return %c0_i32, %c0_i32_0 : i32, i32
  }
  func.func @transform_15(%arg0: i32) -> (i32, i32) {
    %c0_i32 = arith.constant 0 : i32
    %c0_i32_0 = arith.constant 0 : i32
    return %arg0, %c0_i32 : i32, i32
  }
}

</mosaic_0001>

<bundles_post_ra>
// kernel: fashion_mnist_forward.1
= control target key start
LH: loop header
LB: loop body
LE: loop exit
PB: predicated region body
PF: predicated region fallthrough
CT: control target
= control target key end

     0   :  { %s4729_s18 = smov 0   ;;  %s4731_s19 = smov 0   ;;  %s5809_s0 = inlined_call_operand.vmem [shape: bf16[24,32,140], index: 0, kind: input, shape index: {}]   ;;  %s5810_s1 = inlined_call_operand.vmem [shape: bf16[140,144], index: 1, kind: input, shape index: {}]   ;;  %s5811_s2 = inlined_call_operand.vmem [shape: f32[1,144], index: 2, kind: input, shape index: {}]   ;;  %s5812_s3 = inlined_call_operand.vmem [shape: bf16[144,72], index: 3, kind: input, shape index: {}]   ;;  %s5813_s4 = inlined_call_operand.vmem [shape: bf16[144,72], index: 4, kind: input, shape index: {}]   ;;  %s5814_s5 = inlined_call_operand.vmem [shape: bf16[5,72,96], index: 5, kind: input, shape index: {}]   ;;  %s5815_s6 = inlined_call_operand.vmem [shape: f32[1,96], index: 6, kind: input, shape index: {}]   ;;  %s5816_s7 = inlined_call_operand.vmem [shape: bf16[96,48], index: 7, kind: input, shape index: {}]   ;;  %s5817_s8 = inlined_call_operand.vmem [shape: bf16[96,48], index: 8, kind: input, shape index: {}]   ;;  %s5818_s9 = inlined_call_operand.vmem [shape: bf16[4,48,120], index: 9, kind: input, shape index: {}]   ;;  %s5819_s10 = inlined_call_operand.vmem [shape: f32[1,120], index: 10, kind: input, shape index: {}]   ;;  %s5820_s11 = inlined_call_operand.vmem [shape: bf16[120,60], index: 11, kind: input, shape index: {}]   ;;  %s5821_s12 = inlined_call_operand.vmem [shape: f32[1,60], index: 12, kind: input, shape index: {}]   ;;  %s5822_s13 = inlined_call_operand.vmem [shape: bf16[60,128], index: 13, kind: input, shape index: {}]   ;;  %s5823_s14 = inlined_call_operand.vmem [shape: f32[1,128], index: 14, kind: input, shape index: {}]   ;;  %s5824_s15 = inlined_call_operand.vmem [shape: f32[32,128], index: 15, kind: output, shape index: {}]  }
   0x1   :  { %s4733_s20 = smov 0  }
   0x2 LB: > { %s4746_s22 = sadd.s32 1, %s4644_s20   ;;  %s32_s24 = sadd.s32 1, %s4640_s19  ;;  %s4644_s20 = sphi %s4733_s20, %s5841_s20   ;;  %s4640_s19 = sphi %s4731_s19, %s5840_s19   ;;  %s4636_s18 = sphi %s4729_s18, %s5839_s18  }
   0x3   : > { %s29_s23 = ssub.s32 %s4644_s20, %s4746_s22  ;;  %p39_p1 = scmp.ne.s32.totalorder %s4640_s19, %s4636_s18 }
   0x4   : > { %p30_p0 = scmp.eq.s32.totalorder %s29_s23, 0  ;;  %p40_p2 = scmp.eq.s32.totalorder %s4644_s20, 0 }
   0x5   : > { %p3736_p4 = scmp.ge.s32.totalorder %s4644_s20, 2 }
   0x6   : > { %s4755_s25 = scalar_select %p30_p0, %s4640_s19, %s32_s24  }
   0x7   : > { %p41_p3 = por %p40_p2, %p39_p1  ;;  %427 = sbr.rel (%p3736_p4) target bundleno = 40 (0x28), region = 72 }
   0xc   : > { %430 = sbr.rel (!%p41_p3) target bundleno = 40 (0x28), region = 76  ;;  %s432_s26 = sand.u32 (%p41_p3), 1, %s4640_s19  }
   0xd   : > { %s4052_s27 = sshll.u32 (%p41_p3), %s4644_s20, 4  ;;  %s4415_s28 = smul.u32 (%p41_p3), 384, %s432_s26 }
   0xe   : > { %s4763_s16 = scalar_lea.vmem (%p41_p3), %s5809_s0, %s4052_s27 }
   0xf   : > { %v561_v0 = vld [vmem:[%s4763_s16] sm:$0xff] (%p41_p3)  ;;  %v563_v1 = vld [vmem:[%s4763_s16 + $0x8] sm:$0xff] (%p41_p3)  ;;  %s4771_s17 = scalar_lea.vmem (%p41_p3), [#allocation2], %s4415_s28 }
  0x10   : > { %v565_v2 = vld [vmem:[%s4763_s16 + $0x20] sm:$0xff] (%p41_p3)  ;;  %v567_v3 = vld [vmem:[%s4763_s16 + $0x28] sm:$0xff] (%p41_p3)  ;;  %562 = vst [vmem:[%s4771_s17] sm:$0xff] (%p41_p3), %v561_v0  ;;  %564 = vst [vmem:[%s4771_s17 + $0x8] sm:$0xff] (%p41_p3), %v563_v1 }
  0x11   : > { %v569_v4 = vld [vmem:[%s4763_s16 + $0x40] sm:$0xff]  ;;  %v571_v5 = vld [vmem:[%s4763_s16 + $0x48] sm:$0xff]  ;;  %566 = vst [vmem:[%s4771_s17 + $0x10] sm:$0xff] %v565_v2  ;;  %568 = vst [vmem:[%s4771_s17 + $0x18] sm:$0xff] %v567_v3 }
  0x12   : > { %570 = vst [vmem:[%s4771_s17 + $0x20] sm:$0xff] %v569_v4  ;;  %572 = vst [vmem:[%s4771_s17 + $0x28] sm:$0xff] %v571_v5  ;;  %v573_v6 = vld [vmem:[%s4763_s16 + $0x60] sm:$0xff]  ;;  %v575_v7 = vld [vmem:[%s4763_s16 + $0x68] sm:$0xff] }
  0x13   : > { %v577_v8 = vld [vmem:[%s4763_s16 + $0x80] sm:$0xff]  ;;  %574 = vst [vmem:[%s4771_s17 + $0x30] sm:$0xff] %v573_v6  ;;  %576 = vst [vmem:[%s4771_s17 + $0x38] sm:$0xff] %v575_v7  ;;  %v579_v9 = vld [vmem:[%s4763_s16 + $0x88] sm:$0xff] }
  0x14   : > { %578 = vst [vmem:[%s4771_s17 + $0x40] sm:$0xff] %v577_v8  ;;  %v581_v10 = vld [vmem:[%s4763_s16 + $0xa0] sm:$0xff]  ;;  %v583_v11 = vld [vmem:[%s4763_s16 + $0xa8] sm:$0xff]  ;;  %580 = vst [vmem:[%s4771_s17 + $0x48] sm:$0xff] %v579_v9 }
  0x15   : > { %582 = vst [vmem:[%s4771_s17 + $0x50] sm:$0xff] %v581_v10  ;;  %584 = vst [vmem:[%s4771_s17 + $0x58] sm:$0xff] %v583_v11  ;;  %v585_v12 = vld [vmem:[%s4763_s16 + $0xc0] sm:$0xff]  ;;  %v587_v13 = vld [vmem:[%s4763_s16 + $0xc8] sm:$0xff] }
  0x16   : > { %v589_v14 = vld [vmem:[%s4763_s16 + $0xe0] sm:$0xff]  ;;  %586 = vst [vmem:[%s4771_s17 + $0x60] sm:$0xff] %v585_v12  ;;  %588 = vst [vmem:[%s4771_s17 + $0x68] sm:$0xff] %v587_v13  ;;  %v591_v15 = vld [vmem:[%s4763_s16 + $0xe8] sm:$0xff] }
  0x17   : > { %590 = vst [vmem:[%s4771_s17 + $0x70] sm:$0xff] %v589_v14  ;;  %v593_v16 = vld [vmem:[%s4763_s16 + $0x100] sm:$0xff]  ;;  %v595_v17 = vld [vmem:[%s4763_s16 + $0x108] sm:$0xff]  ;;  %592 = vst [vmem:[%s4771_s17 + $0x78] sm:$0xff] %v591_v15 }
  0x18   : > { %594 = vst [vmem:[%s4771_s17 + $0x80] sm:$0xff] %v593_v16  ;;  %596 = vst [vmem:[%s4771_s17 + $0x88] sm:$0xff] %v595_v17  ;;  %v597_v18 = vld [vmem:[%s4763_s16 + $0x120] sm:$0xff]  ;;  %v599_v19 = vld [vmem:[%s4763_s16 + $0x128] sm:$0xff] }
  0x19   : > { %v601_v20 = vld [vmem:[%s4763_s16 + $0x140] sm:$0xff]  ;;  %598 = vst [vmem:[%s4771_s17 + $0x90] sm:$0xff] %v597_v18  ;;  %600 = vst [vmem:[%s4771_s17 + $0x98] sm:$0xff] %v599_v19  ;;  %v603_v21 = vld [vmem:[%s4763_s16 + $0x148] sm:$0xff] }
  0x1a   : > { %602 = vst [vmem:[%s4771_s17 + $0xa0] sm:$0xff] %v601_v20  ;;  %v605_v22 = vld [vmem:[%s4763_s16 + $0x160] sm:$0xff]  ;;  %v607_v23 = vld [vmem:[%s4763_s16 + $0x168] sm:$0xff]  ;;  %604 = vst [vmem:[%s4771_s17 + $0xa8] sm:$0xff] %v603_v21 }
  0x1b   : > { %606 = vst [vmem:[%s4771_s17 + $0xb0] sm:$0xff] %v605_v22  ;;  %608 = vst [vmem:[%s4771_s17 + $0xb8] sm:$0xff] %v607_v23  ;;  %v609_v24 = vld [vmem:[%s4763_s16 + $0x180] sm:$0xff]  ;;  %v611_v25 = vld [vmem:[%s4763_s16 + $0x188] sm:$0xff] }
  0x1c   : > { %v613_v26 = vld [vmem:[%s4763_s16 + $0x1a0] sm:$0xff]  ;;  %610 = vst [vmem:[%s4771_s17 + $0xc0] sm:$0xff] %v609_v24  ;;  %612 = vst [vmem:[%s4771_s17 + $0xc8] sm:$0xff] %v611_v25  ;;  %v615_v27 = vld [vmem:[%s4763_s16 + $0x1a8] sm:$0xff] }
  0x1d   : > { %614 = vst [vmem:[%s4771_s17 + $0xd0] sm:$0xff] %v613_v26  ;;  %v617_v28 = vld [vmem:[%s4763_s16 + $0x1c0] sm:$0xff]  ;;  %v619_v29 = vld [vmem:[%s4763_s16 + $0x1c8] sm:$0xff]  ;;  %616 = vst [vmem:[%s4771_s17 + $0xd8] sm:$0xff] %v615_v27 }
  0x1e   : > { %618 = vst [vmem:[%s4771_s17 + $0xe0] sm:$0xff] %v617_v28  ;;  %620 = vst [vmem:[%s4771_s17 + $0xe8] sm:$0xff] %v619_v29  ;;  %v621_v30 = vld [vmem:[%s4763_s16 + $0x1e0] sm:$0xff]  ;;  %v623_v31 = vld [vmem:[%s4763_s16 + $0x1e8] sm:$0xff] }
  0x1f   : > { %v625_v32 = vld [vmem:[%s4763_s16 + $0x200] sm:$0xff]  ;;  %622 = vst [vmem:[%s4771_s17 + $0xf0] sm:$0xff] %v621_v30  ;;  %624 = vst [vmem:[%s4771_s17 + $0xf8] sm:$0xff] %v623_v31  ;;  %v627_v33 = vld [vmem:[%s4763_s16 + $0x208] sm:$0xff] }
  0x20   : > { %626 = vst [vmem:[%s4771_s17 + $0x100] sm:$0xff] %v625_v32  ;;  %v629_v34 = vld [vmem:[%s4763_s16 + $0x220] sm:$0xff]  ;;  %v631_v35 = vld [vmem:[%s4763_s16 + $0x228] sm:$0xff]  ;;  %628 = vst [vmem:[%s4771_s17 + $0x108] sm:$0xff] %v627_v33 }
  0x21   : > { %630 = vst [vmem:[%s4771_s17 + $0x110] sm:$0xff] %v629_v34  ;;  %632 = vst [vmem:[%s4771_s17 + $0x118] sm:$0xff] %v631_v35  ;;  %v633_v36 = vld [vmem:[%s4763_s16 + $0x240] sm:$0xff]  ;;  %v635_v37 = vld [vmem:[%s4763_s16 + $0x248] sm:$0xff] }
  0x22   : > { %v637_v38 = vld [vmem:[%s4763_s16 + $0x260] sm:$0xff]  ;;  %634 = vst [vmem:[%s4771_s17 + $0x120] sm:$0xff] %v633_v36  ;;  %636 = vst [vmem:[%s4771_s17 + $0x128] sm:$0xff] %v635_v37  ;;  %v639_v39 = vld [vmem:[%s4763_s16 + $0x268] sm:$0xff] }
  0x23   : > { %638 = vst [vmem:[%s4771_s17 + $0x130] sm:$0xff] %v637_v38  ;;  %v641_v40 = vld [vmem:[%s4763_s16 + $0x280] sm:$0xff]  ;;  %v643_v41 = vld [vmem:[%s4763_s16 + $0x288] sm:$0xff]  ;;  %640 = vst [vmem:[%s4771_s17 + $0x138] sm:$0xff] %v639_v39 }
  0x24   : > { %642 = vst [vmem:[%s4771_s17 + $0x140] sm:$0xff] %v641_v40  ;;  %644 = vst [vmem:[%s4771_s17 + $0x148] sm:$0xff] %v643_v41  ;;  %v645_v42 = vld [vmem:[%s4763_s16 + $0x2a0] sm:$0xff]  ;;  %v647_v43 = vld [vmem:[%s4763_s16 + $0x2a8] sm:$0xff] }
  0x25   : > { %v649_v44 = vld [vmem:[%s4763_s16 + $0x2c0] sm:$0xff]  ;;  %646 = vst [vmem:[%s4771_s17 + $0x150] sm:$0xff] %v645_v42  ;;  %648 = vst [vmem:[%s4771_s17 + $0x158] sm:$0xff] %v647_v43  ;;  %v651_v45 = vld [vmem:[%s4763_s16 + $0x2c8] sm:$0xff] }
  0x26   : > { %650 = vst [vmem:[%s4771_s17 + $0x160] sm:$0xff] %v649_v44  ;;  %v653_v46 = vld [vmem:[%s4763_s16 + $0x2e0] sm:$0xff]  ;;  %v655_v47 = vld [vmem:[%s4763_s16 + $0x2e8] sm:$0xff]  ;;  %652 = vst [vmem:[%s4771_s17 + $0x168] sm:$0xff] %v651_v45 }
  0x27   : > { %654 = vst [vmem:[%s4771_s17 + $0x170] sm:$0xff] %v653_v46  ;;  %656 = vst [vmem:[%s4771_s17 + $0x178] sm:$0xff] %v655_v47 }
  0x28 PF: > { %p3740_p5 = scmp.ge.s32.totalorder %s4644_s20, 1  ;;  %p661_p6 = scmp.lt.s32.totalorder %s4644_s20, 3 }
  0x2a   : > { %p662_p7 = pnand %p3740_p5, %p661_p6 }
  0x2c   : > { %665 = sbr.rel (%p662_p7) target bundleno = 1855 (0x73f), region = 114 }
  0x31   : > { %v4444_v48 = vld [vmem:[%s5810_s1 + $0x74] ss:$8 sps:$4 sm:$0xff]   ;;  %v4446_v49 = vld [vmem:[%s5810_s1 + $0x70] ss:$8 sps:$4 sm:$0xff]   ;;  %v4447_v50 = vld [vmem:[%s5810_s1 + $0x64] ss:$8 sps:$4 sm:$0xff]  }
  0x32   : > { %1185 = vmatprep.subr.bf16.mxu0 %v4444_v48  ;;  %v4449_v51 = vld [vmem:[%s5810_s1 + $0x60] ss:$8 sps:$4 sm:$0xff]   ;;  %s668_s17 = sand.u32 1, %s4636_s18   ;;  %v4450_v52 = vld [vmem:[%s5810_s1 + $0x54] ss:$8 sps:$4 sm:$0xff]   ;;  %vm1105_vm0 = vcmask 97280  }
  0x33   : > { %1186 = vmatpush1.bf16.msra.mxu0 %v4446_v49  ;;  %s4416_s24 = smul.u32 384, %s668_s17  ;;  %v4452_v53 = vld [vmem:[%s5810_s1 + $0x50] ss:$8 sps:$4 sm:$0xff]   ;;  %v4453_v54 = vld [vmem:[%s5810_s1 + $0x44] ss:$8 sps:$4 sm:$0xff]   ;;  %vm1178_vm1 = vcmask 1045504  }
  0x34   : > { %1187 = vmatprep.subr.bf16.mxu0 %v4447_v50  ;;  %v4455_v55 = vld [vmem:[%s5810_s1 + $0x40] ss:$8 sps:$4 sm:$0xff]   ;;  %v4456_v56 = vld [vmem:[%s5810_s1 + $0x34] ss:$8 sps:$4 sm:$0xff]   ;;  %v4458_v58 = vld [vmem:[%s5810_s1 + $0x30] ss:$8 sps:$4 sm:$0xff]  }
  0x35   : > { %s4890_s18 = scalar_lea.vmem [#allocation2], %s4416_s24  ;;  %v4459_v59 = vld [vmem:[%s5810_s1 + $0x24] ss:$8 sps:$4 sm:$0xff]   ;;  %v4461_v60 = vld [vmem:[%s5810_s1 + $0x20] ss:$8 sps:$4 sm:$0xff]   ;;  %v4540_v18 = vld [vmem:[%s5812_s3 + $0x38] sm:$0xff]  }
  0x36   : > { %v4473_v57 = vld [vmem:[%s4890_s18 + $0x4] ss:$8 sps:$4 sm:$0xff]   ;;  %v4462_v61 = vld [vmem:[%s5810_s1 + $0x14] ss:$8 sps:$4 sm:$0xff]   ;;  %v4464_v62 = vld [vmem:[%s5810_s1 + $0x10] ss:$8 sps:$4 sm:$0xff]  }
  0x37   : > { %1188 = vmatpush1.bf16.msra.mxu0 %v4449_v51  ;;  %3810 = vmatprep.mubr.msk.bf16.mxu0 %vm1105_vm0, %v4473_v57  ;;  %v4465_v63 = vld [vmem:[%s5810_s1 + $0x4] ss:$8 sps:$4 sm:$0xff]   ;;  %v4467_v0 = vld [vmem:[%s5810_s1] ss:$8 sps:$4 sm:$0xff]   ;;  %v4474_v5 = vld [vmem:[%s4890_s18 + $0x14] ss:$8 sps:$4 sm:$0xff]  }
  0x38   : > { %1189 = vmatprep.subr.bf16.mxu0 %v4450_v52  ;;  %v4468_v1 = vld [vmem:[%s5810_s1 + $0x84] ss:$8 sps:$4 sm:$0x3f]   ;;  %v4470_v2 = vld [vmem:[%s5810_s1 + $0x80] ss:$8 sps:$4 sm:$0x3f]  }
  0x39   : > { %v1180_v3 = vsel %vm1178_vm1, %v4470_v2, 0  ;;  %v4471_v4 = vld [vmem:[%s4890_s18] ss:$8 sps:$4 sm:$0xff]   ;;  %v4476_v6 = vld [vmem:[%s4890_s18 + $0x10] ss:$8 sps:$4 sm:$0xff]   ;;  %v4646_v19 = vmov 0  }
  0x3a   : > { %v4477_v7 = vld [vmem:[%s4890_s18 + $0x24] ss:$8 sps:$4 sm:$0xff]   ;;  %v4479_v8 = vld [vmem:[%s4890_s18 + $0x20] ss:$8 sps:$4 sm:$0xff]   ;;  %v4480_v9 = vld [vmem:[%s4890_s18 + $0x34] ss:$8 sps:$4 sm:$0xff]   ;;  %1735 = vmatprep.subr.bf16.mxu1 %v4646_v19 }
  0x3b   : > { %1190 = vmatpush1.bf16.msra.mxu0 %v4452_v53  ;;  %v4482_v10 = vld [vmem:[%s4890_s18 + $0x30] ss:$8 sps:$4 sm:$0xff]   ;;  %v4483_v11 = vld [vmem:[%s4890_s18 + $0x44] ss:$8 sps:$4 sm:$0xff]   ;;  %v4485_v12 = vld [vmem:[%s4890_s18 + $0x40] ss:$8 sps:$4 sm:$0xff]   ;;  %1736 = vmatpush1.bf16.msra.mxu1 %v4540_v18 }
  0x3c   : > { %1191 = vmatprep.subr.bf16.mxu0 %v4453_v54  ;;  %v4486_v13 = vld [vmem:[%s4890_s18 + $0x54] ss:$8 sps:$4 sm:$0xff]   ;;  %v4488_v14 = vld [vmem:[%s4890_s18 + $0x50] ss:$8 sps:$4 sm:$0xff]   ;;  %v4489_v15 = vld [vmem:[%s4890_s18 + $0x64] ss:$8 sps:$4 sm:$0xff]   ;;  %1737 = vmatprep.subr.bf16.mxu1 %v4646_v19 }
  0x3d   : > { %v4491_v16 = vld [vmem:[%s4890_s18 + $0x60] ss:$8 sps:$4 sm:$0xff]   ;;  %v4492_v17 = vld [vmem:[%s4890_s18 + $0x74] ss:$8 sps:$4 sm:$0xff]   ;;  %v4494_v20 = vld [vmem:[%s4890_s18 + $0x70] ss:$8 sps:$4 sm:$0xff]  }
  0x3e   : > { %v4495_v21 = vld [vmem:[%s4890_s18 + $0x84] ss:$8 sps:$4 sm:$0xff]   ;;  %v4544_v22 = vld [vmem:[%s5812_s3 + $0x30] sm:$0xff]   ;;  %v4497_v24 = vld [vmem:[%s4890_s18 + $0x80] ss:$8 sps:$4 sm:$0xff]   ;;  %vm1698_vm2 = vcmask 130048  }
  0x3f   : > { %1192 = vmatpush1.bf16.msra.mxu0 %v4455_v55  ;;  %v4545_v23 = vld [vmem:[%s5812_s3 + $0x28] sm:$0xff]   ;;  %1738 = vmatpush1.bf16.msra.mxu1 %v4544_v22  ;;  %v4498_v25 = vld [vmem:[%s4890_s18 + $0x94] ss:$8 sps:$4 sm:$0xff]   ;;  %v4546_v26 = vld [vmem:[%s5812_s3 + $0x20] sm:$0xff]   ;;  %vm2172_vm3 = vcmask 1043456   ;;  %vm2147_vm4 = vcmask 588800  }
  0x40   : > { %1193 = vmatprep.subr.bf16.mxu0 %v4456_v56  ;;  %1739 = vmatprep.subr.bf16.mxu1 %v4646_v19  ;;  %v4547_v27 = vld [vmem:[%s5812_s3 + $0x18] sm:$0xff]   ;;  %v4501_v29 = vld [vmem:[%s4890_s18 + $0xa4] ss:$8 sps:$4 sm:$0xff]   ;;  %v4548_v30 = vld [vmem:[%s5812_s3 + $0x10] sm:$0xff]   ;;  %vm2970_vm5 = vcmask 785408   ;;  %vm4648_vm6 = vmmov 0  }
  0x41   : > { %v4500_v28 = vld [vmem:[%s4890_s18 + $0x90] ss:$8 sps:$4 sm:$0xff]   ;;  %v4549_v31 = vld [vmem:[%s5812_s3 + $0x8] sm:$0xff]   ;;  %v4504_v33 = vld [vmem:[%s4890_s18 + $0xb4] ss:$8 sps:$4 sm:$0xff]   ;;  %vm3204_vm7 = vcmask 392192  }
  0x42   : > { %v4503_v32 = vld [vmem:[%s4890_s18 + $0xa0] ss:$8 sps:$4 sm:$0xff]   ;;  %v4506_v36 = vld [vmem:[%s4890_s18 + $0xb0] ss:$8 sps:$4 sm:$0xff]   ;;  %v4507_v37 = vld [vmem:[%s4890_s18 + $0xc4] ss:$8 sps:$4 sm:$0xff]  }
  0x43   : > { %1194 = vmatpush1.bf16.msra.mxu0 %v4458_v58  ;;  %1740 = vmatpush1.bf16.msra.mxu1 %v4545_v23  ;;  %v4550_v34 = vld [vmem:[%s5812_s3] sm:$0xff]   ;;  %v4510_v39 = vld [vmem:[%s4890_s18 + $0xd4] ss:$8 sps:$4 sm:$0xff]   ;;  %v4512_v40 = vld [vmem:[%s4890_s18 + $0xd0] ss:$8 sps:$4 sm:$0xff]   ;;  %vm3532_vm8 = vcmask 982016  }
  0x44   : > { %1195 = vmatprep.subr.bf16.mxu0 %v4459_v59  ;;  %1741 = vmatprep.subr.bf16.mxu1 %v4646_v19  ;;  %v4551_v35 = vld [vmem:[%s5812_s3 + $0x40] sm:$0xff]   ;;  %v4516_v43 = vld [vmem:[%s4890_s18 + $0xf4] ss:$8 sps:$4 sm:$0xff]   ;;  %v4518_v44 = vld [vmem:[%s4890_s18 + $0xf0] ss:$8 sps:$4 sm:$0xff]   ;;  %vm3621_vm9 = vcmask 490496  }
  0x45   : > { %v4509_v38 = vld [vmem:[%s4890_s18 + $0xc0] ss:$8 sps:$4 sm:$0xff]   ;;  %v4513_v41 = vld [vmem:[%s4890_s18 + $0xe4] ss:$8 sps:$4 sm:$0xff]   ;;  %v4522_v47 = vld [vmem:[%s4890_s18 + $0x114] ss:$8 sps:$4 sm:$0xff]  }
  0x46   : > { %v4515_v42 = vld [vmem:[%s4890_s18 + $0xe0] ss:$8 sps:$4 sm:$0xff]   ;;  %v4519_v45 = vld [vmem:[%s4890_s18 + $0x104] ss:$8 sps:$4 sm:$0xff]   ;;  %v4524_v48 = vld [vmem:[%s4890_s18 + $0x110] ss:$8 sps:$4 sm:$0xff]  }
  0x47   : > { %1196 = vmatpush1.bf16.msra.mxu0 %v4461_v60  ;;  %1742 = vmatpush1.bf16.msra.mxu1 %v4546_v26  ;;  %v4521_v46 = vld [vmem:[%s4890_s18 + $0x100] ss:$8 sps:$4 sm:$0xff]   ;;  %v4525_v49 = vld [vmem:[%s4890_s18 + $0x124] ss:$8 sps:$4 sm:$0xff]   ;;  %v4528_v51 = vld [vmem:[%s4890_s18 + $0x134] ss:$8 sps:$4 sm:$0xff]  }
  0x48   : > { %1197 = vmatprep.subr.bf16.mxu0 %v4462_v61  ;;  %1743 = vmatprep.subr.bf16.mxu1 %v4646_v19  ;;  %v4527_v50 = vld [vmem:[%s4890_s18 + $0x120] ss:$8 sps:$4 sm:$0xff]   ;;  %v4530_v52 = vld [vmem:[%s4890_s18 + $0x130] ss:$8 sps:$4 sm:$0xff]   ;;  %v4531_v53 = vld [vmem:[%s4890_s18 + $0x144] ss:$8 sps:$4 sm:$0xff]   ;;  %v791_v61 = vlaneseq }
  0x49   : > { %v4533_v54 = vld [vmem:[%s4890_s18 + $0x140] ss:$8 sps:$4 sm:$0xff]   ;;  %v4534_v55 = vld [vmem:[%s4890_s18 + $0x154] ss:$8 sps:$4 sm:$0xff]   ;;  %v4536_v56 = vld [vmem:[%s4890_s18 + $0x150] ss:$8 sps:$4 sm:$0xff]  }
  0x4a   : > { %v4537_v57 = vld [vmem:[%s4890_s18 + $0x164] ss:$8 sps:$4 sm:$0xff]   ;;  %v4539_v58 = vld [vmem:[%s4890_s18 + $0x160] ss:$8 sps:$4 sm:$0xff]   ;;  %v4541_v59 = vld [vmem:[%s4890_s18 + $0x174] ss:$8 sps:$4 sm:$0xff]  }
  0x4b   : > { %1198 = vmatpush1.bf16.msra.mxu0 %v4464_v62  ;;  %1744 = vmatpush1.bf16.msra.mxu1 %v4547_v27  ;;  %v4543_v60 = vld [vmem:[%s4890_s18 + $0x170] ss:$8 sps:$4 sm:$0xff]   ;;  %s5838_s23 = sadd.s32 4294967295, %s4644_s20  }
  0x4c   : > { %1199 = vmatprep.subr.bf16.mxu0 %v4465_v63  ;;  %1745 = vmatprep.subr.bf16.mxu1 %v4646_v19  ;;  %v792_v63 = vshrl.u32 %v791_v61, 7  ;;  %s3741_s26 = sshll.u32 %s5838_s23, 1 }
  0x4d   : > { %p717_p8 = scmp.lt.s32.totalorder %s3741_s26, 3 }
  0x4e   : > { %v797_v2 = vsub.s32 1, %v792_v63 }
  0x4f   : > { %1200 = vmatpush1.bf16.msra.mxu0 %v4467_v0  ;;  %1746 = vmatpush1.bf16.msra.mxu1 %v4548_v30  ;;  %s5843_s26 = smov (!%p717_p8, %s3741_s26), 3 }
  0x50   : > { %3809 = vmatprep.subr.msk.bf16.mxu0 %vm1178_vm1, %v4468_v1  ;;  %1747 = vmatprep.subr.bf16.mxu1 %v4646_v19  ;;  %s3742_s27 = sshll.u32 %s5843_s26, 3 }
  0x51   : > { %s720_s16 = scalar_lea.vmem %s5824_s15, %s3742_s27 }
  0x53   : > { %1216 = vmatpush2.bf16.msra.mxu0 %v1180_v3  ;;  %1748 = vmatpush1.bf16.msra.mxu1 %v4549_v31  ;;  %v793_v3 = vsub.s32 0, %v792_v63 }
  0x54   : > { %1749 = vmatprep.subr.bf16.mxu1 %v4646_v19 }
  0x56   : > { %1218 = vmatmul.mubr.bf16.vlgmr.msra.gmra.mxu0 %v4471_v4 }
  0x57   : > { %3811 = vmatprep.mubr.msk.bf16.mxu0 %vm1105_vm0, %v4474_v5  ;;  %1750 = vmatpush1.bf16.msra.mxu1 %v4550_v34  ;;  %v789_v5 = vld [vmem:[%s5811_s2] sm:$0x3] }
  0x58   : > { %1765 = vmatprep.subr.bf16.mxu1 %v4646_v19 }
  0x5b   : > { %1766 = vmatpush2.bf16.msra.mxu1 %v4551_v35 }
  0x5c   : > { %1936 = vmatprep.subr.bf16.mxu1 %v4646_v19 }
  0x5e   : > { %1228 = vmatmul.mubr.bf16.gmra.mxu0 %v4476_v6 }
  0x5f   : > { %3812 = vmatprep.mubr.msk.bf16.mxu0 %vm1105_vm0, %v4477_v7  ;;  %v5036_v7 = vrot.slane %v789_v5, %v797_v2 }
  0x66   : > { %1238 = vmatmul.mubr.bf16.gmra.mxu0 %v4479_v8  ;;  %v5038_v8 = vrot.slane %v789_v5, %v793_v3 }
  0x67   : > { %3813 = vmatprep.mubr.msk.bf16.mxu0 %vm1105_vm0, %v4480_v9 }
  0x6e   : > { %1248 = vmatmul.mubr.bf16.gmra.mxu0 %v4482_v10 }
  0x6f   : > { %3814 = vmatprep.mubr.msk.bf16.mxu0 %vm1105_vm0, %v4483_v11 }
  0x76   : > { %1258 = vmatmul.mubr.bf16.gmra.mxu0 %v4485_v12 }
  0x77   : > { %3815 = vmatprep.mubr.msk.bf16.mxu0 %vm1105_vm0, %v4486_v13 }
  0x7e   : > { %1268 = vmatmul.mubr.bf16.gmra.mxu0 %v4488_v14 }
  0x7f   : > { %3816 = vmatprep.mubr.msk.bf16.mxu0 %vm1105_vm0, %v4489_v15 }
  0x86   : > { %1278 = vmatmul.mubr.bf16.gmra.mxu0 %v4491_v16 }
  0x87   : > { %3817 = vmatprep.mubr.msk.bf16.mxu0 %vm1105_vm0, %v4492_v17 }
  0x8e   : > { %1288 = vmatmul.mubr.bf16.gmra.mxu0 %v4494_v20 }
  0x8f   : > { %3818 = vmatprep.mubr.msk.bf16.mxu0 %vm1105_vm0, %v4495_v21 }
  0x96   : > { %1298 = vmatmul.mubr.bf16.gmra.mxu0 %v4497_v24 }
  0x97   : > { %3819 = vmatprep.mubr.msk.bf16.mxu0 %vm1105_vm0, %v4498_v25 }
  0x9e   : > { %1308 = vmatmul.mubr.bf16.gmra.mxu0 %v4500_v28 }
  0x9f   : > { %3820 = vmatprep.mubr.msk.bf16.mxu0 %vm1105_vm0, %v4501_v29 }
  0xa6   : > { %1318 = vmatmul.mubr.bf16.gmra.mxu0 %v4503_v32 }
  0xa7   : > { %3821 = vmatprep.mubr.msk.bf16.mxu0 %vm1105_vm0, %v4504_v33 }
  0xae   : > { %1328 = vmatmul.mubr.bf16.gmra.mxu0 %v4506_v36 }
  0xaf   : > { %3822 = vmatprep.mubr.msk.bf16.mxu0 %vm1105_vm0, %v4507_v37  ;;  %v4552_v37 = vld [vmem:[%s5813_s4 + $0x38] sm:$0xff]  }
  0xb6   : > { %1338 = vmatmul.mubr.bf16.gmra.mxu0 %v4509_v38 }
  0xb7   : > { %3823 = vmatprep.mubr.msk.bf16.mxu0 %vm1105_vm0, %v4510_v39 }
  0xbe   : > { %1348 = vmatmul.mubr.bf16.gmra.mxu0 %v4512_v40 }
  0xbf   : > { %3824 = vmatprep.mubr.msk.bf16.mxu0 %vm1105_vm0, %v4513_v41  ;;  %v4553_v41 = vld [vmem:[%s5813_s4 + $0x30] sm:$0xff]  }
  0xc6   : > { %1358 = vmatmul.mubr.bf16.gmra.mxu0 %v4515_v42 }
  0xc7   : > { %3825 = vmatprep.mubr.msk.bf16.mxu0 %vm1105_vm0, %v4516_v43 }
  0xce   : > { %1368 = vmatmul.mubr.bf16.gmra.mxu0 %v4518_v44 }
  0xcf   : > { %3826 = vmatprep.mubr.msk.bf16.mxu0 %vm1105_vm0, %v4519_v45 }
  0xd6   : > { %1378 = vmatmul.mubr.bf16.gmra.mxu0 %v4521_v46 }
  0xd7   : > { %3827 = vmatprep.mubr.msk.bf16.mxu0 %vm1105_vm0, %v4522_v47 }
  0xde   : > { %1388 = vmatmul.mubr.bf16.gmra.mxu0 %v4524_v48 }
  0xdf   : > { %3828 = vmatprep.mubr.msk.bf16.mxu0 %vm1105_vm0, %v4525_v49 }
  0xe6   : > { %1398 = vmatmul.mubr.bf16.gmra.mxu0 %v4527_v50  ;;  %v4554_v50 = vld [vmem:[%s5813_s4 + $0x28] sm:$0xff]  }
  0xe7   : > { %3829 = vmatprep.mubr.msk.bf16.mxu0 %vm1105_vm0, %v4528_v51 }
  0xee   : > { %1408 = vmatmul.mubr.bf16.gmra.mxu0 %v4530_v52 }
  0xef   : > { %3830 = vmatprep.mubr.msk.bf16.mxu0 %vm1105_vm0, %v4531_v53 }
  0xf6   : > { %1418 = vmatmul.mubr.bf16.gmra.mxu0 %v4533_v54 }
  0xf7   : > { %3831 = vmatprep.mubr.msk.bf16.mxu0 %vm1105_vm0, %v4534_v55 }
  0xfe   : > { %1428 = vmatmul.mubr.bf16.gmra.mxu0 %v4536_v56 }
  0xff   : > { %3832 = vmatprep.mubr.msk.bf16.mxu0 %vm1105_vm0, %v4537_v57 }
 0x106   : > { %1438 = vmatmul.mubr.bf16.gmra.mxu0 %v4539_v58 }
 0x107   : > { %3833 = vmatprep.mubr.msk.bf16.mxu0 %vm1105_vm0, %v4541_v59 }
 0x10e   : > { %1448 = vmatmul.mubr.bf16.gmra.mxu0 %v4543_v60 }
 0x116   : > { %v1219_v62 = vpop.f32.mrf.mxu0 }
 0x117   : > { %v1220_v17 = vadd.f32 %v1219_v62, %v5038_v8  ;;  %v4555_v62 = vld [vmem:[%s5813_s4 + $0x20] sm:$0xff]  }
 0x118   : > { %v1221_v0 = vpop.f32.mrf.mxu0 }
 0x119   : > { %v1222_v14 = vadd.f32 %v1221_v0, %v5036_v7  ;;  %v1458_v29 = vmax.f32 %v1220_v17, 0.0 }
 0x11a   : > { %v1223_v1 = vpop.f32.mrf.mxu0 }
 0x11b   : > { %v1224_v11 = vadd.f32 %v1223_v1, %v5038_v8  ;;  %v1459_v26 = vmax.f32 %v1222_v14, 0.0 }
 0x11c   : > { %v1225_v4 = vpop.f32.mrf.mxu0 }
 0x11d   : > { %v1226_v15 = vadd.f32 %v1225_v4, %v5036_v7  ;;  %v1460_v23 = vmax.f32 %v1224_v11, 0.0 }
 0x11e   : > { %v1229_v6 = vpop.f32.mrf.mxu0 }
 0x11f   : > { %v1230_v12 = vadd.f32 %v1229_v6, %v5038_v8  ;;  %v1461_v27 = vmax.f32 %v1226_v15, 0.0 }
 0x120   : > { %v1231_v9 = vpop.f32.mrf.mxu0 }
 0x121   : > { %v1232_v10 = vadd.f32 %v1231_v9, %v5036_v7  ;;  %v1462_v24 = vmax.f32 %v1230_v12, 0.0  ;;  %v4556_v9 = vld [vmem:[%s5813_s4 + $0x18] sm:$0xff]  }
 0x122   : > { %v1233_v13 = vpop.f32.mrf.mxu0 }
 0x123   : > { %v1234_v16 = vadd.f32 %v1233_v13, %v5038_v8  ;;  %v1463_v20 = vmax.f32 %v1232_v10, 0.0  ;;  %v1554_v34 = vmax.f32 %v1458_v29, %v1462_v24  ;;  %v4557_v13 = vld [vmem:[%s5813_s4 + $0x10] sm:$0xff]  }
 0x124   : > { %v1235_v18 = vpop.f32.mrf.mxu0 }
 0x125   : > { %v1464_v21 = vmax.f32 %v1234_v16, 0.0  ;;  %v1236_v22 = vadd.f32 %v1235_v18, %v5036_v7  ;;  %v1555_v32 = vmax.f32 %v1459_v26, %v1463_v20 }
 0x126   : > { %v1239_v25 = vpop.f32.mrf.mxu0 }
 0x127   : > { %v1465_v28 = vmax.f32 %v1236_v22, 0.0  ;;  %v1556_v30 = vmax.f32 %v1460_v23, %v1464_v21  ;;  %v1240_v51 = vadd.f32 %v1239_v25, %v5038_v8 }
 0x128   : > { %v1241_v31 = vpop.f32.mrf.mxu0 }
 0x129   : > { %v1557_v33 = vmax.f32 %v1461_v27, %v1465_v28  ;;  %v5053_v39 = vpack.c.bf16 %v1556_v30, %v1554_v34  ;;  %v1242_v47 = vadd.f32 %v1241_v31, %v5036_v7  ;;  %v1466_v63 = vmax.f32 %v1240_v51, 0.0 }
 0x12a   : > { %v1243_v35 = vpop.f32.mrf.mxu0 }
 0x12b   : > { %v5048_v36 = vpack.c.bf16 %v1557_v33, %v1555_v32  ;;  %v1244_v44 = vadd.f32 %v1243_v35, %v5038_v8  ;;  %v1467_v59 = vmax.f32 %v1242_v47, 0.0 }
 0x12c   : > { %v1245_v38 = vpop.f32.mrf.mxu0 }
 0x12d   : > { %3843 = vmatprep.mubr.msk.bf16.mxu1 %vm1698_vm2, %v5048_v36  ;;  %v1246_v48 = vadd.f32 %v1245_v38, %v5036_v7  ;;  %v1468_v56 = vmax.f32 %v1244_v44, 0.0  ;;  %v4558_v44 = vld [vmem:[%s5813_s4 + $0x8] sm:$0xff]  }
 0x12e   : > { %v1249_v40 = vpop.f32.mrf.mxu0  ;;  %1768 = vmatmul.mubr.bf16.vlgmr.msra.gmra.mxu1 %v5053_v39 }
 0x12f   : > { %1937 = vmatpush1.bf16.msra.mxu1 %v4552_v37  ;;  %v1250_v45 = vadd.f32 %v1249_v40, %v5038_v8  ;;  %v1469_v60 = vmax.f32 %v1246_v48, 0.0 }
 0x130   : > { %v1251_v42 = vpop.f32.mrf.mxu0  ;;  %1938 = vmatprep.subr.bf16.mxu1 %v4646_v19 }
 0x131   : > { %v1252_v43 = vadd.f32 %v1251_v42, %v5036_v7  ;;  %v1470_v57 = vmax.f32 %v1250_v45, 0.0 }
 0x132   : > { %v1253_v46 = vpop.f32.mrf.mxu0 }
 0x133   : > { %v1254_v49 = vadd.f32 %v1253_v46, %v5038_v8  ;;  %1939 = vmatpush1.bf16.msra.mxu1 %v4553_v41  ;;  %v1471_v53 = vmax.f32 %v1252_v43, 0.0  ;;  %v1558_v4 = vmax.f32 %v1466_v63, %v1470_v57 }
 0x134   : > { %v1255_v52 = vpop.f32.mrf.mxu0  ;;  %1940 = vmatprep.subr.bf16.mxu1 %v4646_v19 }
 0x135   : > { %v1472_v54 = vmax.f32 %v1254_v49, 0.0  ;;  %v1256_v55 = vadd.f32 %v1255_v52, %v5036_v7  ;;  %v1559_v2 = vmax.f32 %v1467_v59, %v1471_v53 }
 0x136   : > { %v1259_v58 = vpop.f32.mrf.mxu0 }
 0x137   : > { %v1473_v61 = vmax.f32 %v1256_v55, 0.0  ;;  %1941 = vmatpush1.bf16.msra.mxu1 %v4554_v50  ;;  %v1560_v0 = vmax.f32 %v1468_v56, %v1472_v54  ;;  %v1260_v23 = vadd.f32 %v1259_v58, %v5038_v8 }
 0x138   : > { %v1261_v1 = vpop.f32.mrf.mxu0  ;;  %1942 = vmatprep.subr.bf16.mxu1 %v4646_v19 }
 0x139   : > { %v1561_v3 = vmax.f32 %v1469_v60, %v1473_v61  ;;  %v5083_v11 = vpack.c.bf16 %v1560_v0, %v1558_v4  ;;  %v1262_v20 = vadd.f32 %v1261_v1, %v5036_v7  ;;  %v1474_v34 = vmax.f32 %v1260_v23, 0.0  ;;  %v4559_v61 = vld [vmem:[%s5813_s4] sm:$0xff]  }
 0x13a   : > { %v1263_v5 = vpop.f32.mrf.mxu0 }
 0x13b   : > { %v5078_v6 = vpack.c.bf16 %v1561_v3, %v1559_v2  ;;  %1943 = vmatpush1.bf16.msra.mxu1 %v4555_v62  ;;  %v1264_v16 = vadd.f32 %v1263_v5, %v5038_v8  ;;  %v1475_v31 = vmax.f32 %v1262_v20, 0.0 }
 0x13c   : > { %v1265_v10 = vpop.f32.mrf.mxu0  ;;  %1944 = vmatprep.subr.bf16.mxu1 %v4646_v19 }
 0x13d   : > { %3844 = vmatprep.mubr.msk.bf16.mxu1 %vm1698_vm2, %v5078_v6  ;;  %v1266_v21 = vadd.f32 %v1265_v10, %v5036_v7  ;;  %v1476_v28 = vmax.f32 %v1264_v16, 0.0  ;;  %v4560_v16 = vld [vmem:[%s5813_s4 + $0x40] sm:$0xff]  }
 0x13e   : > { %v1269_v12 = vpop.f32.mrf.mxu0  ;;  %1776 = vmatmul.mubr.bf16.gmra.mxu1 %v5083_v11 }
 0x13f   : > { %1945 = vmatpush1.bf16.msra.mxu1 %v4556_v9  ;;  %v1270_v17 = vadd.f32 %v1269_v12, %v5038_v8  ;;  %v1477_v32 = vmax.f32 %v1266_v21, 0.0 }
 0x140   : > { %v1271_v14 = vpop.f32.mrf.mxu0  ;;  %1946 = vmatprep.subr.bf16.mxu1 %v4646_v19 }
 0x141   : > { %v1272_v15 = vadd.f32 %v1271_v14, %v5036_v7  ;;  %v1478_v29 = vmax.f32 %v1270_v17, 0.0 }
 0x142   : > { %v1273_v18 = vpop.f32.mrf.mxu0 }
 0x143   : > { %v1274_v22 = vadd.f32 %v1273_v18, %v5038_v8  ;;  %1947 = vmatpush1.bf16.msra.mxu1 %v4557_v13  ;;  %v1479_v25 = vmax.f32 %v1272_v15, 0.0  ;;  %v1562_v41 = vmax.f32 %v1474_v34, %v1478_v29 }
 0x144   : > { %v1275_v24 = vpop.f32.mrf.mxu0  ;;  %1948 = vmatprep.subr.bf16.mxu1 %v4646_v19 }
 0x145   : > { %v1480_v26 = vmax.f32 %v1274_v22, 0.0  ;;  %v1276_v27 = vadd.f32 %v1275_v24, %v5036_v7  ;;  %v1563_v38 = vmax.f32 %v1475_v31, %v1479_v25 }
 0x146   : > { %v1279_v30 = vpop.f32.mrf.mxu0 }
 0x147   : > { %v1481_v33 = vmax.f32 %v1276_v27, 0.0  ;;  %v1564_v35 = vmax.f32 %v1476_v28, %v1480_v26  ;;  %1949 = vmatpush1.bf16.msra.mxu1 %v4558_v44  ;;  %v1280_v56 = vadd.f32 %v1279_v30, %v5038_v8 }
 0x148   : > { %v1281_v37 = vpop.f32.mrf.mxu0  ;;  %1950 = vmatprep.subr.bf16.mxu1 %v4646_v19 }
 0x149   : > { %v1565_v40 = vmax.f32 %v1477_v32, %v1481_v33  ;;  %v5107_v46 = vpack.c.bf16 %v1564_v35, %v1562_v41  ;;  %v1282_v53 = vadd.f32 %v1281_v37, %v5036_v7  ;;  %v1482_v4 = vmax.f32 %v1280_v56, 0.0 }
 0x14a   : > { %v1283_v42 = vpop.f32.mrf.mxu0 }
 0x14b   : > { %v5102_v43 = vpack.c.bf16 %v1565_v40, %v1563_v38  ;;  %v1284_v50 = vadd.f32 %v1283_v42, %v5038_v8  ;;  %v1483_v1 = vmax.f32 %v1282_v53, 0.0  ;;  %1951 = vmatpush1.bf16.msra.mxu1 %v4559_v61 }
 0x14c   : > { %v1285_v45 = vpop.f32.mrf.mxu0  ;;  %1966 = vmatprep.subr.bf16.mxu1 %v4646_v19 }
 0x14d   : > { %3845 = vmatprep.mubr.msk.bf16.mxu1 %vm1698_vm2, %v5102_v43  ;;  %v1286_v54 = vadd.f32 %v1285_v45, %v5036_v7  ;;  %v1484_v62 = vmax.f32 %v1284_v50, 0.0 }
 0x14e   : > { %v1289_v47 = vpop.f32.mrf.mxu0  ;;  %1784 = vmatmul.mubr.bf16.gmra.mxu1 %v5107_v46 }
 0x14f   : > { %v1290_v51 = vadd.f32 %v1289_v47, %v5038_v8  ;;  %v1485_v2 = vmax.f32 %v1286_v54, 0.0  ;;  %1967 = vmatpush2.bf16.msra.mxu1 %v4560_v16 }
 0x150   : > { %v1291_v48 = vpop.f32.mrf.mxu0 }
 0x151   : > { %v1292_v49 = vadd.f32 %v1291_v48, %v5036_v7  ;;  %v1486_v63 = vmax.f32 %v1290_v51, 0.0 }
 0x152   : > { %v1293_v52 = vpop.f32.mrf.mxu0 }
 0x153   : > { %v1294_v55 = vadd.f32 %v1293_v52, %v5038_v8  ;;  %v1487_v58 = vmax.f32 %v1292_v49, 0.0  ;;  %v1566_v13 = vmax.f32 %v1482_v4, %v1486_v63 }
 0x154   : > { %v1295_v57 = vpop.f32.mrf.mxu0 }
 0x155   : > { %v1488_v59 = vmax.f32 %v1294_v55, 0.0  ;;  %v1296_v60 = vadd.f32 %v1295_v57, %v5036_v7  ;;  %v1567_v10 = vmax.f32 %v1483_v1, %v1487_v58 }
 0x156   : > { %v1299_v0 = vpop.f32.mrf.mxu0 }
 0x157   : > { %v1489_v3 = vmax.f32 %v1296_v60, 0.0  ;;  %v1568_v5 = vmax.f32 %v1484_v62, %v1488_v59  ;;  %v1300_v28 = vadd.f32 %v1299_v0, %v5038_v8 }
 0x158   : > { %v1301_v9 = vpop.f32.mrf.mxu0 }
 0x159   : > { %v1569_v12 = vmax.f32 %v1485_v2, %v1489_v3  ;;  %v5130_v18 = vpack.c.bf16 %v1568_v5, %v1566_v13  ;;  %v1302_v25 = vadd.f32 %v1301_v9, %v5036_v7  ;;  %v1490_v41 = vmax.f32 %v1300_v28, 0.0 }
 0x15a   : > { %v1303_v14 = vpop.f32.mrf.mxu0 }
 0x15b   : > { %v5125_v15 = vpack.c.bf16 %v1569_v12, %v1567_v10  ;;  %v1304_v22 = vadd.f32 %v1303_v14, %v5038_v8  ;;  %v1491_v37 = vmax.f32 %v1302_v25, 0.0 }
 0x15c   : > { %v1305_v17 = vpop.f32.mrf.mxu0 }
 0x15d   : > { %3846 = vmatprep.mubr.msk.bf16.mxu1 %vm1698_vm2, %v5125_v15  ;;  %v1306_v26 = vadd.f32 %v1305_v17, %v5036_v7  ;;  %v1492_v33 = vmax.f32 %v1304_v22, 0.0 }
 0x15e   : > { %v1309_v20 = vpop.f32.mrf.mxu0  ;;  %1792 = vmatmul.mubr.bf16.gmra.mxu1 %v5130_v18 }
 0x15f   : > { %v1310_v23 = vadd.f32 %v1309_v20, %v5038_v8  ;;  %v1493_v38 = vmax.f32 %v1306_v26, 0.0 }
 0x160   : > { %v1311_v19 = vpop.f32.mrf.mxu0 }
 0x161   : > { %v1312_v21 = vadd.f32 %v1311_v19, %v5036_v7  ;;  %v1494_v34 = vmax.f32 %v1310_v23, 0.0 }
 0x162   : > { %v1313_v24 = vpop.f32.mrf.mxu0 }
 0x163   : > { %v1314_v27 = vadd.f32 %v1313_v24, %v5038_v8  ;;  %v1495_v30 = vmax.f32 %v1312_v21, 0.0  ;;  %v1570_v48 = vmax.f32 %v1490_v41, %v1494_v34 }
 0x164   : > { %v1315_v29 = vpop.f32.mrf.mxu0 }
 0x165   : > { %v1496_v31 = vmax.f32 %v1314_v27, 0.0  ;;  %v1316_v32 = vadd.f32 %v1315_v29, %v5036_v7  ;;  %v1571_v45 = vmax.f32 %v1491_v37, %v1495_v30 }
 0x166   : > { %v1319_v35 = vpop.f32.mrf.mxu0 }
 0x167   : > { %v1497_v40 = vmax.f32 %v1316_v32, 0.0  ;;  %v1572_v42 = vmax.f32 %v1492_v33, %v1496_v31  ;;  %v1320_v62 = vadd.f32 %v1319_v35, %v5038_v8 }
 0x168   : > { %v1321_v44 = vpop.f32.mrf.mxu0 }
 0x169   : > { %v1573_v47 = vmax.f32 %v1493_v38, %v1497_v40  ;;  %v5145_v52 = vpack.c.bf16 %v1572_v42, %v1570_v48  ;;  %v1322_v59 = vadd.f32 %v1321_v44, %v5036_v7  ;;  %v1498_v13 = vmax.f32 %v1320_v62, 0.0 }
 0x16a   : > { %v1323_v49 = vpop.f32.mrf.mxu0 }
 0x16b   : > { %v5143_v50 = vpack.c.bf16 %v1573_v47, %v1571_v45  ;;  %v1324_v56 = vadd.f32 %v1323_v49, %v5038_v8  ;;  %v1499_v9 = vmax.f32 %v1322_v59, 0.0 }
 0x16c   : > { %v1325_v51 = vpop.f32.mrf.mxu0 }
 0x16d   : > { %3847 = vmatprep.mubr.msk.bf16.mxu1 %vm1698_vm2, %v5143_v50  ;;  %v1326_v60 = vadd.f32 %v1325_v51, %v5036_v7  ;;  %v1500_v3 = vmax.f32 %v1324_v56, 0.0 }
 0x16e   : > { %v1329_v53 = vpop.f32.mrf.mxu0  ;;  %1800 = vmatmul.mubr.bf16.gmra.mxu1 %v5145_v52 }
 0x16f   : > { %v1330_v57 = vadd.f32 %v1329_v53, %v5038_v8  ;;  %v1501_v10 = vmax.f32 %v1326_v60, 0.0 }
 0x170   : > { %v1331_v54 = vpop.f32.mrf.mxu0 }
 0x171   : > { %v1332_v55 = vadd.f32 %v1331_v54, %v5036_v7  ;;  %v1502_v4 = vmax.f32 %v1330_v57, 0.0 }
 0x172   : > { %v1333_v58 = vpop.f32.mrf.mxu0 }
 0x173   : > { %v1334_v61 = vadd.f32 %v1333_v58, %v5038_v8  ;;  %v1503_v0 = vmax.f32 %v1332_v55, 0.0  ;;  %v1574_v19 = vmax.f32 %v1498_v13, %v1502_v4 }
 0x174   : > { %v1335_v63 = vpop.f32.mrf.mxu0 }
 0x175   : > { %v1504_v1 = vmax.f32 %v1334_v61, 0.0  ;;  %v1336_v2 = vadd.f32 %v1335_v63, %v5036_v7  ;;  %v1575_v17 = vmax.f32 %v1499_v9, %v1503_v0 }
 0x176   : > { %v1339_v5 = vpop.f32.mrf.mxu0 }
 0x177   : > { %v1505_v12 = vmax.f32 %v1336_v2, 0.0  ;;  %v1576_v14 = vmax.f32 %v1500_v3, %v1504_v1  ;;  %v1340_v34 = vadd.f32 %v1339_v5, %v5038_v8 }
 0x178   : > { %v1341_v16 = vpop.f32.mrf.mxu0 }
 0x179   : > { %v1577_v20 = vmax.f32 %v1501_v10, %v1505_v12  ;;  %v5160_v24 = vpack.c.bf16 %v1576_v14, %v1574_v19  ;;  %v1342_v31 = vadd.f32 %v1341_v16, %v5036_v7  ;;  %v1506_v49 = vmax.f32 %v1340_v34, 0.0  ;;  %v4561_v19 = vld [vmem:[%s5814_s5 + $0x44] ss:$0 sps:$4 sm:$0xff]  }
 0x17a   : > { %v1343_v21 = vpop.f32.mrf.mxu0  ;;  %4410 = vmatprep.subr.msk.bf16.mxu0 %vm2172_vm3, %v4561_v19 }
 0x17b   : > { %v5158_v22 = vpack.c.bf16 %v1577_v20, %v1575_v17  ;;  %v1344_v28 = vadd.f32 %v1343_v21, %v5038_v8  ;;  %v1507_v45 = vmax.f32 %v1342_v31, 0.0 }
 0x17c   : > { %v1345_v23 = vpop.f32.mrf.mxu0 }
 0x17d   : > { %3848 = vmatprep.mubr.msk.bf16.mxu1 %vm1698_vm2, %v5158_v22  ;;  %v1346_v32 = vadd.f32 %v1345_v23, %v5036_v7  ;;  %v1508_v41 = vmax.f32 %v1344_v28, 0.0 }
 0x17e   : > { %v1349_v25 = vpop.f32.mrf.mxu0  ;;  %1808 = vmatmul.mubr.bf16.gmra.mxu1 %v5160_v24 }
 0x17f   : > { %v1350_v29 = vadd.f32 %v1349_v25, %v5038_v8  ;;  %v1509_v47 = vmax.f32 %v1346_v32, 0.0 }
 0x180   : > { %v1351_v26 = vpop.f32.mrf.mxu0 }
 0x181   : > { %v1352_v27 = vadd.f32 %v1351_v26, %v5036_v7  ;;  %v1510_v42 = vmax.f32 %v1350_v29, 0.0  ;;  %v2174_v29 = vsel %vm2172_vm3, %v4561_v19, 0 }
 0x182   : > { %v1353_v30 = vpop.f32.mrf.mxu0  ;;  %4169 = vmatpush3.bf16.msra.mxu0 %v2174_v29 }
 0x183   : > { %v1354_v33 = vadd.f32 %v1353_v30, %v5038_v8  ;;  %v1511_v37 = vmax.f32 %v1352_v27, 0.0  ;;  %v1578_v56 = vmax.f32 %v1506_v49, %v1510_v42 }
 0x184   : > { %v1355_v35 = vpop.f32.mrf.mxu0 }
 0x185   : > { %v1512_v38 = vmax.f32 %v1354_v33, 0.0  ;;  %v1356_v40 = vadd.f32 %v1355_v35, %v5036_v7  ;;  %v1579_v54 = vmax.f32 %v1507_v45, %v1511_v37 }
 0x186   : > { %v1359_v44 = vpop.f32.mrf.mxu0 }
 0x187   : > { %v1513_v48 = vmax.f32 %v1356_v40, 0.0  ;;  %v1580_v51 = vmax.f32 %v1508_v41, %v1512_v38  ;;  %v1360_v9 = vadd.f32 %v1359_v44, %v5038_v8 }
 0x188   : > { %v1361_v53 = vpop.f32.mrf.mxu0 }
 0x189   : > { %v1581_v55 = vmax.f32 %v1509_v47, %v1513_v48  ;;  %v5175_v60 = vpack.c.bf16 %v1580_v51, %v1578_v56  ;;  %v1362_v3 = vadd.f32 %v1361_v53, %v5036_v7  ;;  %v1514_v26 = vmax.f32 %v1360_v9, 0.0 }
 0x18a   : > { %v1363_v57 = vpop.f32.mrf.mxu0 }
 0x18b   : > { %v5173_v58 = vpack.c.bf16 %v1581_v55, %v1579_v54  ;;  %v1364_v0 = vadd.f32 %v1363_v57, %v5038_v8  ;;  %v1515_v21 = vmax.f32 %v1362_v3, 0.0 }
 0x18c   : > { %v1365_v59 = vpop.f32.mrf.mxu0 }
 0x18d   : > { %3849 = vmatprep.mubr.msk.bf16.mxu1 %vm1698_vm2, %v5173_v58  ;;  %v1366_v4 = vadd.f32 %v1365_v59, %v5036_v7  ;;  %v1516_v16 = vmax.f32 %v1364_v0, 0.0 }
 0x18e   : > { %v1369_v61 = vpop.f32.mrf.mxu0  ;;  %1816 = vmatmul.mubr.bf16.gmra.mxu1 %v5175_v60 }
 0x18f   : > { %v1370_v1 = vadd.f32 %v1369_v61, %v5038_v8  ;;  %v1517_v23 = vmax.f32 %v1366_v4, 0.0 }
 0x190   : > { %v1371_v62 = vpop.f32.mrf.mxu0 }
 0x191   : > { %v1372_v63 = vadd.f32 %v1371_v62, %v5036_v7  ;;  %v1518_v17 = vmax.f32 %v1370_v1, 0.0 }
 0x192   : > { %v1373_v2 = vpop.f32.mrf.mxu0 }
 0x193   : > { %v1374_v5 = vadd.f32 %v1373_v2, %v5038_v8  ;;  %v1519_v12 = vmax.f32 %v1372_v63, 0.0  ;;  %v1582_v32 = vmax.f32 %v1514_v26, %v1518_v17 }
 0x194   : > { %v1375_v10 = vpop.f32.mrf.mxu0 }
 0x195   : > { %v1520_v13 = vmax.f32 %v1374_v5, 0.0  ;;  %v1376_v14 = vadd.f32 %v1375_v10, %v5036_v7  ;;  %v1583_v30 = vmax.f32 %v1515_v21, %v1519_v12 }
 0x196   : > { %v1379_v20 = vpop.f32.mrf.mxu0 }
 0x197   : > { %v1521_v25 = vmax.f32 %v1376_v14, 0.0  ;;  %v1584_v27 = vmax.f32 %v1516_v16, %v1520_v13  ;;  %v1380_v51 = vadd.f32 %v1379_v20, %v5038_v8 }
 0x198   : > { %v1381_v28 = vpop.f32.mrf.mxu0 }
 0x199   : > { %v1585_v31 = vmax.f32 %v1517_v23, %v1521_v25  ;;  %v5195_v37 = vpack.c.bf16 %v1584_v27, %v1582_v32  ;;  %v1382_v47 = vadd.f32 %v1381_v28, %v5036_v7  ;;  %v1522_v1 = vmax.f32 %v1380_v51, 0.0 }
 0x19a   : > { %v1383_v33 = vpop.f32.mrf.mxu0 }
 0x19b   : > { %v5193_v34 = vpack.c.bf16 %v1585_v31, %v1583_v30  ;;  %v1384_v42 = vadd.f32 %v1383_v33, %v5038_v8  ;;  %v1523_v62 = vmax.f32 %v1382_v47, 0.0 }
 0x19c   : > { %v1385_v35 = vpop.f32.mrf.mxu0 }
 0x19d   : > { %3850 = vmatprep.mubr.msk.bf16.mxu1 %vm1698_vm2, %v5193_v34  ;;  %v1386_v48 = vadd.f32 %v1385_v35, %v5036_v7  ;;  %v1524_v57 = vmax.f32 %v1384_v42, 0.0 }
 0x19e   : > { %v1389_v38 = vpop.f32.mrf.mxu0  ;;  %1824 = vmatmul.mubr.bf16.gmra.mxu1 %v5195_v37 }
 0x19f   : > { %v1390_v44 = vadd.f32 %v1389_v38, %v5038_v8  ;;  %v1525_v63 = vmax.f32 %v1386_v48, 0.0 }
 0x1a0   : > { %v1391_v40 = vpop.f32.mrf.mxu0 }
 0x1a1   : > { %v1392_v41 = vadd.f32 %v1391_v40, %v5036_v7  ;;  %v1526_v59 = vmax.f32 %v1390_v44, 0.0  ;;  %v4562_v44 = vld [vmem:[%s5814_s5 + $0x3c] sm:$0xff]  }
 0x1a2   : > { %v1393_v45 = vpop.f32.mrf.mxu0  ;;  %4170 = vmatprep.subr.bf16.mxu0 %v4562_v44 }
 0x1a3   : > { %v1394_v49 = vadd.f32 %v1393_v45, %v5038_v8  ;;  %v1527_v54 = vmax.f32 %v1392_v41, 0.0  ;;  %v1586_v9 = vmax.f32 %v1522_v1, %v1526_v59  ;;  %4171 = vmatpush3.bf16.msra.mxu0 %v4562_v44 }
 0x1a4   : > { %v1395_v53 = vpop.f32.mrf.mxu0 }
 0x1a5   : > { %v1528_v55 = vmax.f32 %v1394_v49, 0.0  ;;  %v1396_v56 = vadd.f32 %v1395_v53, %v5036_v7  ;;  %v1587_v4 = vmax.f32 %v1523_v62, %v1527_v54 }
 0x1a6   : > { %v1399_v61 = vpop.f32.mrf.mxu0 }
 0x1a7   : > { %v1529_v0 = vmax.f32 %v1396_v56, 0.0  ;;  %v1588_v2 = vmax.f32 %v1524_v57, %v1528_v55  ;;  %v1400_v28 = vadd.f32 %v1399_v61, %v5038_v8 }
 0x1a8   : > { %v1401_v3 = vpop.f32.mrf.mxu0 }
 0x1a9   : > { %v1589_v5 = vmax.f32 %v1525_v63, %v1529_v0  ;;  %v5210_v14 = vpack.c.bf16 %v1588_v2, %v1586_v9  ;;  %v1402_v25 = vadd.f32 %v1401_v3, %v5036_v7  ;;  %v1530_v45 = vmax.f32 %v1400_v28, 0.0 }
 0x1aa   : > { %v1403_v10 = vpop.f32.mrf.mxu0 }
 0x1ab   : > { %v5208_v12 = vpack.c.bf16 %v1589_v5, %v1587_v4  ;;  %v1404_v19 = vadd.f32 %v1403_v10, %v5038_v8  ;;  %v1531_v40 = vmax.f32 %v1402_v25, 0.0 }
 0x1ac   : > { %v1405_v13 = vpop.f32.mrf.mxu0 }
 0x1ad   : > { %3851 = vmatprep.mubr.msk.bf16.mxu1 %vm1698_vm2, %v5208_v12  ;;  %v1406_v26 = vadd.f32 %v1405_v13, %v5036_v7  ;;  %v1532_v33 = vmax.f32 %v1404_v19, 0.0 }
 0x1ae   : > { %v1409_v16 = vpop.f32.mrf.mxu0  ;;  %1832 = vmatmul.mubr.bf16.gmra.mxu1 %v5210_v14 }
 0x1af   : > { %v1410_v21 = vadd.f32 %v1409_v16, %v5038_v8  ;;  %v1533_v41 = vmax.f32 %v1406_v26, 0.0 }
 0x1b0   : > { %v1411_v17 = vpop.f32.mrf.mxu0 }
 0x1b1   : > { %v1412_v20 = vadd.f32 %v1411_v17, %v5036_v7  ;;  %v1534_v35 = vmax.f32 %v1410_v21, 0.0 }
 0x1b2   : > { %v1413_v23 = vpop.f32.mrf.mxu0 }
 0x1b3   : > { %v1414_v27 = vadd.f32 %v1413_v23, %v5038_v8  ;;  %v1535_v30 = vmax.f32 %v1412_v20, 0.0  ;;  %v1590_v53 = vmax.f32 %v1530_v45, %v1534_v35 }
 0x1b4   : > { %v1415_v29 = vpop.f32.mrf.mxu0 }
 0x1b5   : > { %v1536_v31 = vmax.f32 %v1414_v27, 0.0  ;;  %v1416_v32 = vadd.f32 %v1415_v29, %v5036_v7  ;;  %v1591_v49 = vmax.f32 %v1531_v40, %v1535_v30 }
 0x1b6   : > { %v1419_v38 = vpop.f32.mrf.mxu0 }
 0x1b7   : > { %v1537_v42 = vmax.f32 %v1416_v32, 0.0  ;;  %v1592_v47 = vmax.f32 %v1532_v33, %v1536_v31  ;;  %v1420_v5 = vadd.f32 %v1419_v38, %v5038_v8 }
 0x1b8   : > { %v1421_v48 = vpop.f32.mrf.mxu0 }
 0x1b9   : > { %v1593_v51 = vmax.f32 %v1533_v41, %v1537_v42  ;;  %v5228_v57 = vpack.c.bf16 %v1592_v47, %v1590_v53  ;;  %v1422_v2 = vadd.f32 %v1421_v48, %v5036_v7  ;;  %v1538_v26 = vmax.f32 %v1420_v5, 0.0 }
 0x1ba   : > { %v1423_v54 = vpop.f32.mrf.mxu0 }
 0x1bb   : > { %v5226_v55 = vpack.c.bf16 %v1593_v51, %v1591_v49  ;;  %v1424_v63 = vadd.f32 %v1423_v54, %v5038_v8  ;;  %v1539_v21 = vmax.f32 %v1422_v2, 0.0 }
 0x1bc   : > { %v1425_v56 = vpop.f32.mrf.mxu0 }
 0x1bd   : > { %3852 = vmatprep.mubr.msk.bf16.mxu1 %vm1698_vm2, %v5226_v55  ;;  %v1426_v3 = vadd.f32 %v1425_v56, %v5036_v7  ;;  %v1540_v17 = vmax.f32 %v1424_v63, 0.0 }
 0x1be   : > { %v1429_v59 = vpop.f32.mrf.mxu0  ;;  %1840 = vmatmul.mubr.bf16.gmra.mxu1 %v5228_v57 }
 0x1bf   : > { %v1430_v0 = vadd.f32 %v1429_v59, %v5038_v8  ;;  %v1541_v23 = vmax.f32 %v1426_v3, 0.0 }
 0x1c0   : > { %v1431_v61 = vpop.f32.mrf.mxu0 }
 0x1c1   : > { %v1432_v62 = vadd.f32 %v1431_v61, %v5036_v7  ;;  %v1542_v20 = vmax.f32 %v1430_v0, 0.0 }
 0x1c2   : > { %v1433_v1 = vpop.f32.mrf.mxu0 }
 0x1c3   : > { %v1434_v4 = vadd.f32 %v1433_v1, %v5038_v8  ;;  %v1543_v10 = vmax.f32 %v1432_v62, 0.0  ;;  %v1594_v31 = vmax.f32 %v1538_v26, %v1542_v20 }
 0x1c4   : > { %v1435_v9 = vpop.f32.mrf.mxu0 }
 0x1c5   : > { %v1544_v13 = vmax.f32 %v1434_v4, 0.0  ;;  %v1436_v16 = vadd.f32 %v1435_v9, %v5036_v7  ;;  %v1595_v29 = vmax.f32 %v1539_v21, %v1543_v10 }
 0x1c6   : > { %v1439_v19 = vpop.f32.mrf.mxu0 }
 0x1c7   : > { %v1545_v25 = vmax.f32 %v1436_v16, 0.0  ;;  %v1596_v27 = vmax.f32 %v1540_v17, %v1544_v13  ;;  %v1440_v53 = vadd.f32 %v1439_v19, %v5038_v8  ;;  %v4564_v19 = vld [vmem:[%s5814_s5 + $0x2c] sm:$0xff]  }
 0x1c8   : > { %v1441_v28 = vpop.f32.mrf.mxu0 }
 0x1c9   : > { %v1597_v30 = vmax.f32 %v1541_v23, %v1545_v25  ;;  %v5243_v38 = vpack.c.bf16 %v1596_v27, %v1594_v31  ;;  %v1442_v48 = vadd.f32 %v1441_v28, %v5036_v7  ;;  %v1546_v3 = vmax.f32 %v1440_v53, 0.0  ;;  %v4570_v25 = vld [vmem:[%s5814_s5] sm:$0xff]  }
 0x1ca   : > { %v1443_v32 = vpop.f32.mrf.mxu0 }
 0x1cb   : > { %v5241_v33 = vpack.c.bf16 %v1597_v30, %v1595_v29  ;;  %v1444_v44 = vadd.f32 %v1443_v32, %v5038_v8  ;;  %v1547_v0 = vmax.f32 %v1442_v48, 0.0 }
 0x1cc   : > { %v1445_v35 = vpop.f32.mrf.mxu0 }
 0x1cd   : > { %3853 = vmatprep.mubr.msk.bf16.mxu1 %vm1698_vm2, %v5241_v33  ;;  %v1446_v49 = vadd.f32 %v1445_v35, %v5036_v7  ;;  %v1548_v62 = vmax.f32 %v1444_v44, 0.0 }
 0x1ce   : > { %v1449_v40 = vpop.f32.mrf.mxu0  ;;  %1848 = vmatmul.mubr.bf16.gmra.mxu1 %v5243_v38 }
 0x1cf   : > { %v1450_v45 = vadd.f32 %v1449_v40, %v5038_v8  ;;  %v1549_v1 = vmax.f32 %v1446_v49, 0.0  ;;  %v4572_v40 = vld [vmem:[%s5814_s5 + $0x8c] ss:$0 sps:$4 sm:$0xff]  }
 0x1d0   : > { %v1451_v41 = vpop.f32.mrf.mxu0 }
 0x1d1   : > { %v1452_v42 = vadd.f32 %v1451_v41, %v5036_v7  ;;  %v1550_v63 = vmax.f32 %v1450_v45, 0.0 }
 0x1d2   : > { %v1453_v47 = vpop.f32.mrf.mxu0 }
 0x1d3   : > { %v1454_v51 = vadd.f32 %v1453_v47, %v5038_v8  ;;  %v1551_v56 = vmax.f32 %v1452_v42, 0.0  ;;  %v1598_v10 = vmax.f32 %v1546_v3, %v1550_v63 }
 0x1d4   : > { %v1455_v54 = vpop.f32.mrf.mxu0 }
 0x1d5   : > { %v1552_v59 = vmax.f32 %v1454_v51, 0.0  ;;  %v1456_v61 = vadd.f32 %v1455_v54, %v5036_v7  ;;  %v1599_v5 = vmax.f32 %v1547_v0, %v1551_v56  ;;  %v4563_v7 = vld [vmem:[%s5814_s5 + $0x34] sm:$0xff]  }
 0x1d6   : > { %4172 = vmatprep.subr.bf16.mxu0 %v4563_v7 }
 0x1d7   : > { %v1553_v2 = vmax.f32 %v1456_v61, 0.0  ;;  %v1600_v4 = vmax.f32 %v1548_v62, %v1552_v59  ;;  %4173 = vmatpush3.bf16.msra.mxu0 %v4563_v7 }
 0x1d8   : > { %4174 = vmatprep.subr.bf16.mxu0 %v4564_v19 }
 0x1d9   : > { %v1601_v9 = vmax.f32 %v1549_v1, %v1553_v2  ;;  %v5258_v16 = vpack.c.bf16 %v1600_v4, %v1598_v10 }
 0x1db   : > { %v5256_v13 = vpack.c.bf16 %v1601_v9, %v1599_v5  ;;  %4175 = vmatpush3.bf16.msra.mxu0 %v4564_v19 }
 0x1dd   : > { %3854 = vmatprep.mubr.msk.bf16.mxu1 %vm1698_vm2, %v5256_v13 }
 0x1de   : > { %1856 = vmatmul.mubr.bf16.gmra.mxu1 %v5258_v16 }
 0x1df   : > { %3864 = vmatprep.mubr.msk.bf16.mxu1 %vm1698_vm2, %v5048_v36 }
 0x1e6   : > { %1969 = vmatmul.mubr.bf16.vlgmr.msra.gmra.mxu1 %v5053_v39 }
 0x1e7   : > { %3865 = vmatprep.mubr.msk.bf16.mxu1 %vm1698_vm2, %v5078_v6 }
 0x1ee   : > { %v5271_v8 = vpop.f32.mrf.mxu1  ;;  %1977 = vmatmul.mubr.bf16.gmra.mxu1 %v5083_v11 }
 0x1ef   : > { %3866 = vmatprep.mubr.msk.bf16.mxu1 %vm1698_vm2, %v5102_v43 }
 0x1f0   : > { %v1771_v17 = vpop.f32.mrf.mxu1 }
 0x1f2   : > { %v5276_v36 = vpop.f32.mrf.mxu1 }
 0x1f4   : > { %v1774_v20 = vpop.f32.mrf.mxu1 }
 0x1f6   : > { %1985 = vmatmul.mubr.bf16.gmra.mxu1 %v5107_v46 }
 0x1f7   : > { %3867 = vmatprep.mubr.msk.bf16.mxu1 %vm1698_vm2, %v5125_v15 }
 0x1fe   : > { %v5281_v39 = vpop.f32.mrf.mxu1  ;;  %1993 = vmatmul.mubr.bf16.gmra.mxu1 %v5130_v18 }
 0x1ff   : > { %3868 = vmatprep.mubr.msk.bf16.mxu1 %vm1698_vm2, %v5143_v50 }
 0x200   : > { %v1779_v6 = vpop.f32.mrf.mxu1 }
 0x202   : > { %v5286_v11 = vpop.f32.mrf.mxu1 }
 0x204   : > { %v1782_v43 = vpop.f32.mrf.mxu1 }
 0x206   : > { %2001 = vmatmul.mubr.bf16.gmra.mxu1 %v5145_v52  ;;  %v4565_v52 = vld [vmem:[%s5814_s5 + $0x20] ss:$0 sps:$4 sm:$0xff]  }
 0x207   : > { %3869 = vmatprep.mubr.msk.bf16.mxu1 %vm1698_vm2, %v5158_v22  ;;  %4411 = vmatprep.subr.msk.bf16.mxu1 %vm2172_vm3, %v4565_v52  ;;  %v2304_v22 = vsel %vm2172_vm3, %v4565_v52, 0 }
 0x208   : > { %4195 = vmatpush3.bf16.msra.mxu1 %v2304_v22  ;;  %v2600_v22 = vsel %vm2172_vm3, %v4572_v40, 0 }
 0x20e   : > { %v5294_v46 = vpop.f32.mrf.mxu1  ;;  %2009 = vmatmul.mubr.bf16.gmra.mxu1 %v5160_v24 }
 0x20f   : > { %3870 = vmatprep.mubr.msk.bf16.mxu1 %vm1698_vm2, %v5173_v58 }
 0x210   : > { %v1787_v15 = vpop.f32.mrf.mxu1 }
 0x212   : > { %v5299_v18 = vpop.f32.mrf.mxu1 }
 0x214   : > { %v1790_v50 = vpop.f32.mrf.mxu1 }
 0x216   : > { %2017 = vmatmul.mubr.bf16.gmra.mxu1 %v5175_v60  ;;  %v4566_v60 = vld [vmem:[%s5814_s5 + $0x18] sm:$0xff]  }
 0x217   : > { %3871 = vmatprep.mubr.msk.bf16.mxu1 %vm1698_vm2, %v5193_v34  ;;  %4196 = vmatprep.subr.bf16.mxu1 %v4566_v60  ;;  %v4567_v34 = vld [vmem:[%s5814_s5 + $0x10] sm:$0xff]  }
 0x218   : > { %4197 = vmatpush3.bf16.msra.mxu1 %v4566_v60 }
 0x219   : > { %4198 = vmatprep.subr.bf16.mxu1 %v4567_v34 }
 0x21c   : > { %4199 = vmatpush3.bf16.msra.mxu1 %v4567_v34 }
 0x21e   : > { %v5309_v24 = vpop.f32.mrf.mxu1  ;;  %2025 = vmatmul.mubr.bf16.gmra.mxu1 %v5195_v37  ;;  %v4568_v37 = vld [vmem:[%s5814_s5 + $0x8] sm:$0xff]  }
 0x21f   : > { %3872 = vmatprep.mubr.msk.bf16.mxu1 %vm1698_vm2, %v5208_v12  ;;  %4200 = vmatprep.subr.bf16.mxu1 %v4568_v37 }
 0x220   : > { %v1795_v58 = vpop.f32.mrf.mxu1  ;;  %4201 = vmatpush3.bf16.msra.mxu1 %v4568_v37 }
 0x221   : > { %4202 = vmatprep.subr.bf16.mxu1 %v4570_v25 }
 0x222   : > { %v5314_v21 = vpop.f32.mrf.mxu1 }
 0x224   : > { %v1798_v23 = vpop.f32.mrf.mxu1  ;;  %4203 = vmatpush3.bf16.msra.mxu1 %v4570_v25  ;;  %v4577_v25 = vld [vmem:[%s5814_s5 + $0x74] sm:$0xff]  }
 0x225   : > { %4413 = vmatprep.subr.msk.bf16.mxu1 %vm2172_vm3, %v4572_v40 }
 0x226   : > { %2033 = vmatmul.mubr.bf16.gmra.mxu1 %v5210_v14 }
 0x227   : > { %3873 = vmatprep.mubr.msk.bf16.mxu1 %vm1698_vm2, %v5226_v55  ;;  %v4569_v55 = vld [vmem:[%s5814_s5 + $0x24] sm:$0xff]  }
 0x228   : > { %4176 = vmatprep.subr.bf16.mxu0 %v4569_v55 }
 0x229   : > { %4177 = vmatpush3.bf16.msra.mxu0 %v4569_v55  ;;  %v4573_v55 = vld [vmem:[%s5814_s5 + $0x60] sm:$0xff]  }
 0x22e   : > { %v5328_v12 = vpop.f32.mrf.mxu1  ;;  %2041 = vmatmul.mubr.bf16.gmra.mxu1 %v5228_v57 }
 0x22f   : > { %3874 = vmatprep.mubr.msk.bf16.mxu1 %vm1698_vm2, %v5241_v33 }
 0x230   : > { %v1803_v14 = vpop.f32.mrf.mxu1 }
 0x232   : > { %v5339_v26 = vpop.f32.mrf.mxu1 }
 0x234   : > { %v1806_v57 = vpop.f32.mrf.mxu1 }
 0x236   : > { %2049 = vmatmul.mubr.bf16.gmra.mxu1 %v5243_v38  ;;  %v4571_v38 = vld [vmem:[%s5814_s5 + $0x68] ss:$0 sps:$4 sm:$0xff]  }
 0x237   : > { %3875 = vmatprep.mubr.msk.bf16.mxu1 %vm1698_vm2, %v5256_v13  ;;  %4412 = vmatprep.subr.msk.bf16.mxu0 %vm2172_vm3, %v4571_v38  ;;  %v2444_v14 = vsel %vm2172_vm3, %v4571_v38, 0 }
 0x23e   : > { %v5344_v27 = vpop.f32.mrf.mxu1  ;;  %2057 = vmatmul.mubr.bf16.gmra.mxu1 %v5258_v16 }
 0x240   : > { %v1811_v28 = vpop.f32.mrf.mxu1 }
 0x241   : > { %v4579_v28 = vld [vmem:[%s5814_s5 + $0x6c] sm:$0xff]  }
 0x242   : > { %v5347_v29 = vpop.f32.mrf.mxu1 }
 0x244   : > { %v1814_v30 = vpop.f32.mrf.mxu1 }
 0x24e   : > { %v5349_v31 = vpop.f32.mrf.mxu1 }
 0x250   : > { %v1819_v32 = vpop.f32.mrf.mxu1 }
 0x252   : > { %v5351_v33 = vpop.f32.mrf.mxu1 }
 0x254   : > { %v1822_v35 = vpop.f32.mrf.mxu1 }
 0x25e   : > { %v5361_v41 = vpop.f32.mrf.mxu1 }
 0x260   : > { %v1827_v42 = vpop.f32.mrf.mxu1 }
 0x261   : > { %v4578_v42 = vld [vmem:[%s5814_s5 + $0x50] sm:$0xff]  }
 0x262   : > { %v5363_v44 = vpop.f32.mrf.mxu1 }
 0x264   : > { %v1830_v45 = vpop.f32.mrf.mxu1 }
 0x26e   : > { %v5365_v47 = vpop.f32.mrf.mxu1 }
 0x270   : > { %v1835_v48 = vpop.f32.mrf.mxu1 }
 0x272   : > { %v5367_v49 = vpop.f32.mrf.mxu1 }
 0x274   : > { %v1838_v51 = vpop.f32.mrf.mxu1 }
 0x27e   : > { %v5369_v53 = vpop.f32.mrf.mxu1 }
 0x280   : > { %v1843_v54 = vpop.f32.mrf.mxu1 }
 0x282   : > { %v5371_v56 = vpop.f32.mrf.mxu1 }
 0x284   : > { %v1846_v59 = vpop.f32.mrf.mxu1 }
 0x28e   : > { %v5373_v61 = vpop.f32.mrf.mxu1 }
 0x290   : > { %v1851_v62 = vpop.f32.mrf.mxu1 }
 0x292   : > { %v5375_v63 = vpop.f32.mrf.mxu1 }
 0x294   : > { %v1854_v0 = vpop.f32.mrf.mxu1 }
 0x295   : > { %v4581_v0 = vld [vmem:[%s5814_s5 + $0xb0] ss:$0 sps:$4 sm:$0xff]  }
 0x29e   : > { %v5377_v1 = vpop.f32.mrf.mxu1 }
 0x2a0   : > { %v1859_v2 = vpop.f32.mrf.mxu1 }
 0x2a2   : > { %v5379_v3 = vpop.f32.mrf.mxu1 }
 0x2a4   : > { %v1862_v4 = vpop.f32.mrf.mxu1 }
 0x2a6   : > { %v1970_v5 = vpop.f32.mrf.mxu1 }
 0x2a7   : > { %v2065_v13 = vmax.f32 %v5271_v8, %v1970_v5  ;;  %v4574_v8 = vld [vmem:[%s5814_s5 + $0x84] sm:$0xff]  }
 0x2a8   : > { %v1972_v9 = vpop.f32.mrf.mxu1 }
 0x2aa   : > { %v1973_v10 = vpop.f32.mrf.mxu1 }
 0x2ab   : > { %v2066_v16 = vmax.f32 %v5276_v36, %v1973_v10 }
 0x2ac   : > { %v1975_v7 = vpop.f32.mrf.mxu1 }
 0x2ad   : > { %v2089_v17 = vpack.c.bf16 %v2066_v16, %v2065_v13 }
 0x2ae   : > { %v1978_v20 = vpop.f32.mrf.mxu1 }
 0x2af   : > { %4204 = vmatprep.mubr.msk.bf16.mxu1 %vm2147_vm4, %v2089_v17  ;;  %v2067_v19 = vmax.f32 %v5281_v39, %v1978_v20  ;;  %v4576_v39 = vld [vmem:[%s5814_s5 + $0x7c] sm:$0xff]  }
 0x2b0   : > { %v1980_v6 = vpop.f32.mrf.mxu1 }
 0x2b2   : > { %v1981_v43 = vpop.f32.mrf.mxu1 }
 0x2b3   : > { %v2068_v15 = vmax.f32 %v5286_v11, %v1981_v43 }
 0x2b4   : > { %v1983_v50 = vpop.f32.mrf.mxu1 }
 0x2b5   : > { %v2090_v52 = vpack.c.bf16 %v2068_v15, %v2067_v19 }
 0x2b6   : > { %v1986_v36 = vpop.f32.mrf.mxu1 }
 0x2b7   : > { %4178 = vmatprep.mubr.msk.bf16.mxu0 %vm2147_vm4, %v2090_v52  ;;  %4205 = vmatmul.mubr.msk.bf16.vlgmr.msra.gmra.mxu1 %vm2147_vm4, %v2090_v52  ;;  %v2069_v23 = vmax.f32 %v5294_v46, %v1986_v36 }
 0x2b8   : > { %v1988_v58 = vpop.f32.mrf.mxu1  ;;  %4247 = vmatpush3.bf16.msra.mxu1 %v2600_v22 }
 0x2b9   : > { %4248 = vmatprep.subr.bf16.mxu1 %v4574_v8 }
 0x2ba   : > { %v1989_v11 = vpop.f32.mrf.mxu1 }
 0x2bb   : > { %v2070_v60 = vmax.f32 %v5299_v18, %v1989_v11  ;;  %v4575_v18 = vld [vmem:[%s5814_s5 + $0x58] sm:$0xff]  }
 0x2bc   : > { %v1991_v34 = vpop.f32.mrf.mxu1  ;;  %4249 = vmatpush3.bf16.msra.mxu1 %v4574_v8 }
 0x2bd   : > { %v5397_v37 = vpack.c.bf16 %v2070_v60, %v2069_v23  ;;  %4250 = vmatprep.subr.bf16.mxu1 %v4576_v39 }
 0x2be   : > { %v1994_v57 = vpop.f32.mrf.mxu1 }
 0x2bf   : > { %4179 = vmatmul.mubr.msk.bf16.vlgmr.msra.gmra.mxu0 %vm2147_vm4, %v5397_v37  ;;  %4208 = vmatprep.mubr.msk.bf16.mxu1 %vm2147_vm4, %v5397_v37  ;;  %v2071_v32 = vmax.f32 %v5309_v24, %v1994_v57 }
 0x2c0   : > { %v1996_v46 = vpop.f32.mrf.mxu1  ;;  %4221 = vmatpush3.bf16.msra.mxu0 %v2444_v14  ;;  %4251 = vmatpush3.bf16.msra.mxu1 %v4576_v39  ;;  %v4583_v14 = vld [vmem:[%s5814_s5 + $0xa0] sm:$0xff]  }
 0x2c1   : > { %4222 = vmatprep.subr.bf16.mxu0 %v4573_v55  ;;  %4252 = vmatprep.subr.bf16.mxu1 %v4577_v25 }
 0x2c2   : > { %v1997_v30 = vpop.f32.mrf.mxu1 }
 0x2c3   : > { %v2072_v35 = vmax.f32 %v5314_v21, %v1997_v30  ;;  %v4580_v21 = vld [vmem:[%s5814_s5 + $0x48] sm:$0xff]   ;;  %v4584_v30 = vld [vmem:[%s5814_s5 + $0x98] sm:$0xff]  }
 0x2c4   : > { %v1999_v38 = vpop.f32.mrf.mxu1  ;;  %4223 = vmatpush3.bf16.msra.mxu0 %v4573_v55  ;;  %4253 = vmatpush3.bf16.msra.mxu1 %v4577_v25 }
 0x2c5   : > { %v5418_v40 = vpack.c.bf16 %v2072_v35, %v2071_v32  ;;  %4224 = vmatprep.subr.bf16.mxu0 %v4575_v18  ;;  %4254 = vmatprep.subr.bf16.mxu1 %v4579_v28  ;;  %v4585_v35 = vld [vmem:[%s5814_s5 + $0x90] sm:$0xff]  }
 0x2c6   : > { %v2002_v45 = vpop.f32.mrf.mxu1 }
 0x2c7   : > { %4182 = vmatprep.mubr.msk.bf16.mxu0 %vm2147_vm4, %v5418_v40  ;;  %4209 = vmatmul.mubr.msk.bf16.gmra.mxu1 %vm2147_vm4, %v5418_v40  ;;  %v2073_v51 = vmax.f32 %v5328_v12, %v2002_v45 }
 0x2c8   : > { %v2004_v24 = vpop.f32.mrf.mxu1  ;;  %4225 = vmatpush3.bf16.msra.mxu0 %v4575_v18  ;;  %4255 = vmatpush3.bf16.msra.mxu1 %v4579_v28 }
 0x2c9   : > { %4226 = vmatprep.subr.bf16.mxu0 %v4578_v42  ;;  %v4586_v24 = vld [vmem:[%s5816_s7 + $0x28] sm:$0xff]  }
 0x2ca   : > { %v2005_v48 = vpop.f32.mrf.mxu1  ;;  %4298 = vmatprep.subr.bf16.mxu1 %v4586_v24 }
 0x2cb   : > { %v2074_v54 = vmax.f32 %v5339_v26, %v2005_v48  ;;  %v4590_v48 = vld [vmem:[%s5816_s7 + $0x8] sm:$0xff]  }
 0x2cc   : > { %v2007_v59 = vpop.f32.mrf.mxu1  ;;  %4227 = vmatpush3.bf16.msra.mxu0 %v4578_v42 }
 0x2cd   : > { %v5432_v62 = vpack.c.bf16 %v2074_v54, %v2073_v51  ;;  %4228 = vmatprep.subr.bf16.mxu0 %v4580_v21  ;;  %v4591_v51 = vld [vmem:[%s5816_s7] sm:$0xff]   ;;  %v5541_v54 = vld [vmem:[%s5817_s8 + $0x28] sm:$0xff]  }
 0x2ce   : > { %v2010_v2 = vpop.f32.mrf.mxu1  ;;  %5826 = vst [vmem:[#allocation3_spill] sm:$0xff] %v5541_v54 }
 0x2cf   : > { %4183 = vmatmul.mubr.msk.bf16.gmra.mxu0 %vm2147_vm4, %v5432_v62  ;;  %4212 = vmatprep.mubr.msk.bf16.mxu1 %vm2147_vm4, %v5432_v62  ;;  %v2075_v26 = vmax.f32 %v5344_v27, %v2010_v2 }
 0x2d0   : > { %v2012_v4 = vpop.f32.mrf.mxu1  ;;  %4229 = vmatpush3.bf16.msra.mxu0 %v4580_v21  ;;  %v4587_v21 = vld [vmem:[%s5816_s7 + $0x20] sm:$0xff]  }
 0x2d1   : > { %4414 = vmatprep.subr.msk.bf16.mxu0 %vm2172_vm3, %v4581_v0 }
 0x2d2   : > { %v2013_v12 = vpop.f32.mrf.mxu1 }
 0x2d3   : > { %v2076_v5 = vmax.f32 %v5347_v29, %v2013_v12 }
 0x2d4   : > { %v2015_v9 = vpop.f32.mrf.mxu1 }
 0x2d5   : > { %v5444_v10 = vpack.c.bf16 %v2076_v5, %v2075_v26 }
 0x2d6   : > { %v2018_v13 = vpop.f32.mrf.mxu1 }
 0x2d7   : > { %4186 = vmatprep.mubr.msk.bf16.mxu0 %vm2147_vm4, %v5444_v10  ;;  %4213 = vmatmul.mubr.msk.bf16.gmra.mxu1 %vm2147_vm4, %v5444_v10  ;;  %v2077_v17 = vmax.f32 %v5349_v31, %v2018_v13 }
 0x2d8   : > { %v2020_v16 = vpop.f32.mrf.mxu1 }
 0x2da   : > { %v2021_v7 = vpop.f32.mrf.mxu1 }
 0x2db   : > { %v2078_v20 = vmax.f32 %v5351_v33, %v2021_v7 }
 0x2dc   : > { %v2023_v6 = vpop.f32.mrf.mxu1 }
 0x2dd   : > { %v5452_v27 = vpack.c.bf16 %v2078_v20, %v2077_v17 }
 0x2de   : > { %v2026_v29 = vpop.f32.mrf.mxu1 }
 0x2df   : > { %4187 = vmatmul.mubr.msk.bf16.gmra.mxu0 %vm2147_vm4, %v5452_v27  ;;  %4216 = vmatprep.mubr.msk.bf16.mxu1 %vm2147_vm4, %v5452_v27  ;;  %v2079_v15 = vmax.f32 %v5361_v41, %v2026_v29 }
 0x2e0   : > { %v2028_v43 = vpop.f32.mrf.mxu1 }
 0x2e2   : > { %v2029_v19 = vpop.f32.mrf.mxu1 }
 0x2e3   : > { %v2080_v50 = vmax.f32 %v5363_v44, %v2029_v19 }
 0x2e4   : > { %v2031_v52 = vpop.f32.mrf.mxu1 }
 0x2e5   : > { %v2096_v31 = vpack.c.bf16 %v2080_v50, %v2079_v15 }
 0x2e6   : > { %v2034_v22 = vpop.f32.mrf.mxu1 }
 0x2e7   : > { %4190 = vmatprep.mubr.msk.bf16.mxu0 %vm2147_vm4, %v2096_v31  ;;  %4217 = vmatmul.mubr.msk.bf16.gmra.mxu1 %vm2147_vm4, %v2096_v31  ;;  %v2081_v36 = vmax.f32 %v5365_v47, %v2034_v22  ;;  %v2756_v47 = vsel %vm2172_vm3, %v4581_v0, 0 }
 0x2e8   : > { %v2036_v33 = vpop.f32.mrf.mxu1  ;;  %4256 = vmatprep.mubr.msk.bf16.mxu1 %vm2147_vm4, %v5418_v40 }
 0x2ea   : > { %v2037_v8 = vpop.f32.mrf.mxu1 }
 0x2eb   : > { %v2082_v58 = vmax.f32 %v5367_v49, %v2037_v8  ;;  %v4582_v49 = vld [vmem:[%s5814_s5 + $0xa8] sm:$0xff]  }
 0x2ec   : > { %v2039_v39 = vpop.f32.mrf.mxu1 }
 0x2ed   : > { %v2097_v41 = vpack.c.bf16 %v2082_v58, %v2081_v36 }
 0x2ee   : > { %v2042_v11 = vpop.f32.mrf.mxu1 }
 0x2ef   : > { %4191 = vmatmul.mubr.msk.bf16.gmra.mxu0 %vm2147_vm4, %v2097_v41  ;;  %4257 = vmatmul.mubr.msk.bf16.vlgmr.msra.gmra.mxu1 %vm2147_vm4, %v5432_v62  ;;  %v2083_v57 = vmax.f32 %v5369_v53, %v2042_v11 }
 0x2f0   : > { %v2044_v44 = vpop.f32.mrf.mxu1  ;;  %4230 = vmatprep.mubr.msk.bf16.mxu0 %vm2147_vm4, %v5397_v37  ;;  %4260 = vmatprep.mubr.msk.bf16.mxu1 %vm2147_vm4, %v5444_v10 }
 0x2f1   : > { %4299 = vmatpush3.bf16.msra.mxu1 %v4586_v24 }
 0x2f2   : > { %v2045_v23 = vpop.f32.mrf.mxu1  ;;  %4300 = vmatprep.subr.bf16.mxu1 %v4587_v21 }
 0x2f3   : > { %v2084_v55 = vmax.f32 %v5371_v56, %v2045_v23 }
 0x2f4   : > { %v2047_v60 = vpop.f32.mrf.mxu1 }
 0x2f5   : > { %v2098_v18 = vpack.c.bf16 %v2084_v55, %v2083_v57  ;;  %4301 = vmatpush3.bf16.msra.mxu1 %v4587_v21 }
 0x2f6   : > { %v2050_v34 = vpop.f32.mrf.mxu1 }
 0x2f7   : > { %4231 = vmatmul.mubr.msk.bf16.vlgmr.msra.gmra.mxu0 %vm2147_vm4, %v5418_v40  ;;  %4261 = vmatmul.mubr.msk.bf16.gmra.mxu1 %vm2147_vm4, %v5452_v27  ;;  %v2085_v38 = vmax.f32 %v5373_v61, %v2050_v34 }
 0x2f8   : > { %4273 = vmatpush3.bf16.msra.mxu0 %v2756_v47  ;;  %v2052_v37 = vpop.f32.mrf.mxu1  ;;  %4234 = vmatprep.mubr.msk.bf16.mxu0 %vm2147_vm4, %v5432_v62 }
 0x2f9   : > { %4264 = vmatprep.mubr.msk.bf16.mxu1 %vm2147_vm4, %v2096_v31  ;;  %4274 = vmatprep.subr.bf16.mxu0 %v4582_v49 }
 0x2fa   : > { %v2053_v25 = vpop.f32.mrf.mxu1 }
 0x2fb   : > { %v2086_v53 = vmax.f32 %v5375_v63, %v2053_v25 }
 0x2fc   : > { %v2055_v46 = vpop.f32.mrf.mxu1  ;;  %4275 = vmatpush3.bf16.msra.mxu0 %v4582_v49 }
 0x2fd   : > { %4276 = vmatprep.subr.bf16.mxu0 %v4583_v14  ;;  %v2099_v42 = vpack.c.bf16 %v2086_v53, %v2085_v38 }
 0x2fe   : > { %v2058_v28 = vpop.f32.mrf.mxu1 }
 0x2ff   : > { %4235 = vmatmul.mubr.msk.bf16.gmra.mxu0 %vm2147_vm4, %v5444_v10  ;;  %4265 = vmatmul.mubr.msk.bf16.gmra.mxu1 %vm2147_vm4, %v2097_v41  ;;  %v2087_v63 = vmax.f32 %v5377_v1, %v2058_v28  ;;  %v4589_v1 = vld [vmem:[%s5816_s7 + $0x10] sm:$0xff]  }
 0x300   : > { %v2060_v32 = vpop.f32.mrf.mxu1  ;;  %4238 = vmatprep.mubr.msk.bf16.mxu0 %vm2147_vm4, %v5452_v27  ;;  %4268 = vmatprep.mubr.msk.bf16.mxu1 %vm2147_vm4, %v2098_v18 }
 0x301   : > { %4277 = vmatpush3.bf16.msra.mxu0 %v4583_v14 }
 0x302   : > { %v2061_v56 = vpop.f32.mrf.mxu1  ;;  %4278 = vmatprep.subr.bf16.mxu0 %v4584_v30 }
 0x303   : > { %v2088_v61 = vmax.f32 %v5379_v3, %v2061_v56  ;;  %v4588_v3 = vld [vmem:[%s5816_s7 + $0x18] sm:$0xff]  }
 0x304   : > { %v2063_v40 = vpop.f32.mrf.mxu1  ;;  %4302 = vmatprep.subr.bf16.mxu1 %v4588_v3 }
 0x305   : > { %4279 = vmatpush3.bf16.msra.mxu0 %v4584_v30  ;;  %v2100_v45 = vpack.c.bf16 %v2088_v61, %v2087_v63  ;;  %4303 = vmatpush3.bf16.msra.mxu1 %v4588_v3 }
 0x306   : > { %4280 = vmatprep.subr.bf16.mxu0 %v4585_v35  ;;  %4304 = vmatprep.subr.bf16.mxu1 %v4589_v1 }
 0x307   : > { %4239 = vmatmul.mubr.msk.bf16.gmra.mxu0 %vm2147_vm4, %v2096_v31  ;;  %4269 = vmatmul.mubr.msk.bf16.gmra.mxu1 %vm2147_vm4, %v2099_v42 }
 0x308   : > { %4242 = vmatprep.mubr.msk.bf16.mxu0 %vm2147_vm4, %v2097_v41 }
 0x309   : > { %4281 = vmatpush3.bf16.msra.mxu0 %v4585_v35  ;;  %4305 = vmatpush3.bf16.msra.mxu1 %v4589_v1 }
 0x30a   : > { %4306 = vmatprep.subr.bf16.mxu1 %v4590_v48 }
 0x30d   : > { %4307 = vmatpush3.bf16.msra.mxu1 %v4590_v48 }
 0x30e   : > { %4308 = vmatprep.subr.bf16.mxu1 %v4591_v51 }
 0x30f   : > { %4243 = vmatmul.mubr.msk.bf16.gmra.mxu0 %vm2147_vm4, %v2098_v18 }
 0x310   : > { %4282 = vmatprep.mubr.msk.bf16.mxu0 %vm2147_vm4, %v5432_v62 }
 0x311   : > { %4309 = vmatpush3.bf16.msra.mxu1 %v4591_v51 }
 0x312   : > { %4318 = vmatprep.subr.bf16.mxu1 %v5541_v54 }
 0x317   : > { %4283 = vmatmul.mubr.msk.bf16.vlgmr.msra.gmra.mxu0 %vm2147_vm4, %v5444_v10 }
 0x318   : > { %4286 = vmatprep.mubr.msk.bf16.mxu0 %vm2147_vm4, %v5452_v27 }
 0x31f   : > { %4287 = vmatmul.mubr.msk.bf16.gmra.mxu0 %vm2147_vm4, %v2096_v31 }
 0x320   : > { %4290 = vmatprep.mubr.msk.bf16.mxu0 %vm2147_vm4, %v2097_v41 }
 0x327   : > { %4291 = vmatmul.mubr.msk.bf16.gmra.mxu0 %vm2147_vm4, %v2098_v18 }
 0x328   : > { %4294 = vmatprep.mubr.msk.bf16.mxu0 %vm2147_vm4, %v2099_v42 }
 0x32f   : > { %4295 = vmatmul.mubr.msk.bf16.gmra.mxu0 %vm2147_vm4, %v2100_v45 }
 0x377   : > { %v4206_v59 = vpop.f32.mrf.mxu1 }
 0x379   : > { %v2340_v62 = vpop.f32.mrf.mxu1 }
 0x37b   : > { %v4207_v0 = vpop.f32.mrf.mxu1 }
 0x37d   : > { %v2343_v4 = vpop.f32.mrf.mxu1 }
 0x37f   : > { %v4180_v2 = vpop.f32.mrf.mxu0 }
 0x380   : > { %v2349_v40 = vadd.f32 %v4206_v59, %v4180_v2 }
 0x381   : > { %v2210_v12 = vpop.f32.mrf.mxu0 }
 0x382   : > { %v2341_v61 = vadd.f32 %v2340_v62, %v2210_v12 }
 0x383   : > { %v4181_v5 = vpop.f32.mrf.mxu0 }
 0x384   : > { %v2352_v21 = vadd.f32 %v4207_v0, %v4181_v5  ;;  %v5600_v0 = vld [vmem:[%s5815_s6] ss:$0 sm:$0xff] }
 0x385   : > { %v2213_v10 = vpop.f32.mrf.mxu0 }
 0x386   : > { %v2344_v48 = vadd.f32 %v2343_v4, %v2213_v10 }
 0x387   : > { %v4210_v26 = vpop.f32.mrf.mxu1 }
 0x389   : > { %v5544_v9 = vpop.f32.mrf.mxu1 }
 0x38b   : > { %v5546_v13 = vpop.f32.mrf.mxu1 }
 0x38d   : > { %v5548_v7 = vpop.f32.mrf.mxu1 }
 0x38f   : > { %v4184_v16 = vpop.f32.mrf.mxu0 }
 0x391   : > { %v2226_v17 = vpop.f32.mrf.mxu0 }
 0x392   : > { %v2357_v62 = vadd.f32 %v5544_v9, %v2226_v17 }
 0x393   : > { %v4185_v6 = vpop.f32.mrf.mxu0 }
 0x394   : > { %v2368_v4 = vadd.f32 %v5546_v13, %v4185_v6 }
 0x395   : > { %v5554_v29 = vpop.f32.mrf.mxu0 }
 0x396   : > { %v2360_v9 = vadd.f32 %v5548_v7, %v5554_v29 }
 0x397   : > { %v5550_v20 = vpop.f32.mrf.mxu1 }
 0x399   : > { %v5552_v27 = vpop.f32.mrf.mxu1 }
 0x39b   : > { %v5556_v43 = vpop.f32.mrf.mxu1 }
 0x39d   : > { %v5560_v15 = vpop.f32.mrf.mxu1 }
 0x39f   : > { %v5558_v19 = vpop.f32.mrf.mxu0 }
 0x3a1   : > { %v5562_v50 = vpop.f32.mrf.mxu0 }
 0x3a2   : > { %v2373_v7 = vadd.f32 %v5552_v27, %v5562_v50 }
 0x3a3   : > { %v5566_v31 = vpop.f32.mrf.mxu0 }
 0x3a5   : > { %v5570_v33 = vpop.f32.mrf.mxu0 }
 0x3a6   : > { %v2376_v50 = vadd.f32 %v5560_v15, %v5570_v33 }
 0x3a7   : > { %v5564_v52 = vpop.f32.mrf.mxu1 }
 0x3a9   : > { %v5568_v22 = vpop.f32.mrf.mxu1 }
 0x3ab   : > { %v5572_v8 = vpop.f32.mrf.mxu1 }
 0x3ac   : > { %5827 = vst [vmem:[#allocation4_spill] sm:$0xff] %v5572_v8 }
 0x3ad   : > { %v5578_v39 = vpop.f32.mrf.mxu1 }
 0x3ae   : > { %5828 = vst [vmem:[#allocation5_spill] sm:$0xff] %v5578_v39 }
 0x3af   : > { %v5574_v36 = vpop.f32.mrf.mxu0  ;;  %v4258_v44 = vpop.f32.mrf.mxu1 }
 0x3b0   : > { %v2397_v33 = vadd.f32 %v5564_v52, %v5574_v36 }
 0x3b1   : > { %v5576_v58 = vpop.f32.mrf.mxu0  ;;  %v2636_v47 = vpop.f32.mrf.mxu1 }
 0x3b3   : > { %v5580_v41 = vpop.f32.mrf.mxu0  ;;  %v4259_v37 = vpop.f32.mrf.mxu1 }
 0x3b4   : > { %5829 = vst [vmem:[#allocation6_spill] sm:$0xff] %v5580_v41 }
 0x3b5   : > { %v5582_v11 = vpop.f32.mrf.mxu0  ;;  %v2639_v25 = vpop.f32.mrf.mxu1 }
 0x3b6   : > { %5830 = vst [vmem:[#allocation7_spill] sm:$0xff] %v5582_v11 }
 0x3b7   : > { %v4232_v23 = vpop.f32.mrf.mxu0  ;;  %v4262_v18 = vpop.f32.mrf.mxu1 }
 0x3b8   : > { %v2545_v45 = vadd.f32 %v4232_v23, %v2349_v40 }
 0x3b9   : > { %v2480_v60 = vpop.f32.mrf.mxu0  ;;  %v2652_v32 = vpop.f32.mrf.mxu1 }
 0x3ba   : > { %v2543_v3 = vadd.f32 %v2480_v60, %v2341_v61  ;;  %v2701_v39 = vadd.f32 %v4258_v44, %v2545_v45 }
 0x3bb   : > { %v4233_v49 = vpop.f32.mrf.mxu0  ;;  %v4263_v35 = vpop.f32.mrf.mxu1 }
 0x3bc   : > { %v2546_v51 = vadd.f32 %v4233_v49, %v2352_v21  ;;  %v2699_v41 = vadd.f32 %v2636_v47, %v2543_v3  ;;  %v2384_v3 = vadd.f32 %v5556_v43, %v5566_v31 }
 0x3bd   : > { %v2483_v34 = vpop.f32.mrf.mxu0  ;;  %v2655_v63 = vpop.f32.mrf.mxu1 }
 0x3be   : > { %v2544_v8 = vadd.f32 %v2483_v34, %v2344_v48  ;;  %v2702_v23 = vadd.f32 %v4259_v37, %v2546_v51 }
 0x3bf   : > { %v4236_v14 = vpop.f32.mrf.mxu0  ;;  %v4266_v54 = vpop.f32.mrf.mxu1 }
 0x3c1   : > { %v2496_v55 = vpop.f32.mrf.mxu0  ;;  %v2668_v12 = vpop.f32.mrf.mxu1 }
 0x3c2   : > { %v2547_v60 = vadd.f32 %v2496_v55, %v2357_v62 }
 0x3c3   : > { %v4237_v57 = vpop.f32.mrf.mxu0  ;;  %v4267_v49 = vpop.f32.mrf.mxu1 }
 0x3c4   : > { %v2550_v17 = vadd.f32 %v4237_v57, %v2368_v4 }
 0x3c5   : > { %v2499_v46 = vpop.f32.mrf.mxu0  ;;  %v2671_v40 = vpop.f32.mrf.mxu1 }
 0x3c6   : > { %v2548_v37 = vadd.f32 %v2499_v46, %v2360_v9  ;;  %v2706_v57 = vadd.f32 %v4263_v35, %v2550_v17  ;;  %v5832_v17 = vld [vmem:[#allocation6_spill] sm:$0xff] }
 0x3c7   : > { %v4240_v28 = vpop.f32.mrf.mxu0  ;;  %v4270_v62 = vpop.f32.mrf.mxu1 }
 0x3c8   : > { %v2704_v51 = vadd.f32 %v2655_v63, %v2548_v37 }
 0x3c9   : > { %v2512_v30 = vpop.f32.mrf.mxu0 }
 0x3cb   : > { %v5584_v53 = vpop.f32.mrf.mxu0 }
 0x3cc   : > { %v2554_v35 = vadd.f32 %v5584_v53, %v2384_v3  ;;  %v2389_v53 = vadd.f32 %v5568_v22, %v5576_v58 }
 0x3cd   : > { %v5586_v56 = vpop.f32.mrf.mxu0 }
 0x3cf   : > { %v5588_v38 = vpop.f32.mrf.mxu0 }
 0x3d0   : > { %5831 = vst [vmem:[#allocation8_spill] sm:$0xff] %v5588_v38  ;;  %v2365_v38 = vadd.f32 %v4210_v26, %v4184_v16  ;;  %v2700_v16 = vadd.f32 %v2639_v25, %v2544_v8  ;;  %v2381_v8 = vadd.f32 %v5550_v20, %v5558_v19 }
 0x3d1   : > { %v5590_v42 = vpop.f32.mrf.mxu0 }
 0x3d2   : > { %v2549_v10 = vadd.f32 %v4236_v14, %v2365_v38  ;;  %v2703_v38 = vadd.f32 %v2652_v32, %v2547_v60  ;;  %v2553_v48 = vadd.f32 %v4240_v28, %v2381_v8 }
 0x3d3   : > { %v5592_v24 = vpop.f32.mrf.mxu0 }
 0x3d4   : > { %v2705_v55 = vadd.f32 %v4262_v18, %v2549_v10  ;;  %v2551_v18 = vadd.f32 %v2512_v30, %v2373_v7  ;;  %v2552_v30 = vadd.f32 %v5586_v56, %v2376_v50  ;;  %v2709_v63 = vadd.f32 %v4266_v54, %v2553_v48 }
 0x3d5   : > { %v5594_v1 = vpop.f32.mrf.mxu0 }
 0x3d6   : > { %v2707_v15 = vadd.f32 %v2668_v12, %v2551_v18  ;;  %v2555_v12 = vadd.f32 %v5590_v42, %v2389_v53  ;;  %v2708_v52 = vadd.f32 %v2671_v40, %v2552_v30  ;;  %v5837_v18 = vld [vmem:[#allocation3_spill] sm:$0xff] }
 0x3d7   : > { %v4284_v11 = vpop.f32.mrf.mxu0 }
 0x3d8   : > { %v2857_v59 = vadd.f32 %v4284_v11, %v2701_v39 }
 0x3d9   : > { %v2792_v2 = vpop.f32.mrf.mxu0 }
 0x3da   : > { %v2855_v5 = vadd.f32 %v2792_v2, %v2699_v41  ;;  %v2880_v39 = vadd.f32 %v5600_v0, %v2857_v59 }
 0x3db   : > { %v4285_v44 = vpop.f32.mrf.mxu0 }
 0x3dc   : > { %v2878_v47 = vadd.f32 %v5600_v0, %v2855_v5  ;;  %v2858_v26 = vadd.f32 %v4285_v44, %v2702_v23  ;;  %v2896_v29 = vmax.f32 %v2880_v39, 0.0  ;;  %v5833_v39 = vld [vmem:[#allocation4_spill] sm:$0xff] }
 0x3dd   : > { %v2795_v11 = vpop.f32.mrf.mxu0 }
 0x3de   : > { %v2881_v41 = vadd.f32 %v5600_v0, %v2858_v26  ;;  %v2856_v34 = vadd.f32 %v2795_v11, %v2700_v16  ;;  %v2894_v6 = vmax.f32 %v2878_v47, 0.0  ;;  %v2710_v47 = vadd.f32 %v4267_v49, %v2554_v35  ;;  %v2684_v26 = vpop.f32.mrf.mxu1  ;;  %v5835_v49 = vld [vmem:[#allocation7_spill] sm:$0xff] }
 0x3df   : > { %v4288_v13 = vpop.f32.mrf.mxu0  ;;  %v2400_v11 = vadd.f32 %v5833_v39, %v5832_v17  ;;  %v4600_v17 = vld [vmem:[%s5818_s9 + $0x10] sm:$0xff]   ;;  %v4601_v39 = vld [vmem:[%s5818_s9 + $0x18] sm:$0xff]  }
 0x3e0   : > { %v2879_v14 = vadd.f32 %v5600_v0, %v2856_v34  ;;  %v2897_v61 = vmax.f32 %v2881_v41, 0.0  ;;  %v2861_v21 = vadd.f32 %v4288_v13, %v2705_v55  ;;  %v2910_v59 = vmax.f32 %v2894_v6, %v2896_v29  ;;  %v5834_v41 = vld [vmem:[#allocation8_spill] sm:$0xff]  ;;  %v5836_v6 = vld [vmem:[#allocation5_spill] sm:$0xff]  ;;  %v4271_v7 = vpop.f32.mrf.mxu1 }
 0x3e1   : > { %v2808_v25 = vpop.f32.mrf.mxu0  ;;  %v2557_v34 = vadd.f32 %v5834_v41, %v2397_v33  ;;  %v2558_v55 = vadd.f32 %v5592_v24, %v2400_v11  ;;  %v2711_v24 = vadd.f32 %v2684_v26, %v2555_v12  ;;  %v4602_v11 = vld [vmem:[%s5818_s9 + $0x8] sm:$0xff]   ;;  %v4603_v41 = vld [vmem:[%s5818_s9] sm:$0xff]  }
 0x3e2   : > { %v2895_v45 = vmax.f32 %v2879_v14, 0.0  ;;  %v2859_v46 = vadd.f32 %v2808_v25, %v2703_v38  ;;  %v2884_v43 = vadd.f32 %v5600_v0, %v2861_v21  ;;  %v2392_v14 = vadd.f32 %v5836_v6, %v5835_v49 }
 0x3e3   : > { %v4289_v32 = vpop.f32.mrf.mxu0 }
 0x3e4   : > { %v2911_v20 = vmax.f32 %v2895_v45, %v2897_v61  ;;  %v2882_v19 = vadd.f32 %v5600_v0, %v2859_v46  ;;  %v2862_v27 = vadd.f32 %v4289_v32, %v2706_v57  ;;  %v2900_v56 = vmax.f32 %v2884_v43, 0.0  ;;  %v4593_v57 = vld [vmem:[%s5817_s8 + $0x20] sm:$0xff]  }
 0x3e5   : > { %v2811_v2 = vpop.f32.mrf.mxu0  ;;  %v2556_v40 = vadd.f32 %v5594_v1, %v2392_v14  ;;  %v2713_v46 = vadd.f32 %v4270_v62, %v2557_v34  ;;  %v2714_v32 = vadd.f32 %v4271_v7, %v2558_v55  ;;  %v4594_v1 = vld [vmem:[%s5817_s8 + $0x18] sm:$0xff]   ;;  %v4604_v7 = vld [vmem:[%s5818_s9 + $0x40] sm:$0xff]  }
 0x3e6   : > { %v5619_v5 = vpack.c.bf16 %v2911_v20, %v2910_v59  ;;  %v2885_v31 = vadd.f32 %v5600_v0, %v2862_v27  ;;  %v2860_v28 = vadd.f32 %v2811_v2, %v2704_v51  ;;  %v2898_v4 = vmax.f32 %v2882_v19, 0.0  ;;  %v2687_v51 = vpop.f32.mrf.mxu1 }
 0x3e7   : > { %v4292_v23 = vpop.f32.mrf.mxu0  ;;  %v2712_v35 = vadd.f32 %v2687_v51, %v2556_v40  ;;  %v4605_v40 = vld [vmem:[%s5818_s9 + $0x58] sm:$0xff]  }
 0x3e8   : > { %v2883_v10 = vadd.f32 %v5600_v0, %v2860_v28  ;;  %4310 = vmatprep.mubr.msk.bf16.mxu1 %vm2970_vm5, %v5619_v5  ;;  %v2865_v44 = vadd.f32 %v4292_v23, %v2709_v63  ;;  %v2901_v54 = vmax.f32 %v2885_v31, 0.0  ;;  %v2912_v36 = vmax.f32 %v2898_v4, %v2900_v56  ;;  %v4610_v51 = vld [vmem:[%s5820_s11 + $0x38] ss:$0 sps:$4 sm:$0xff]  }
 0x3e9   : > { %v2824_v60 = vpop.f32.mrf.mxu0 }
 0x3ea   : > { %v2899_v16 = vmax.f32 %v2883_v10, 0.0  ;;  %v2863_v9 = vadd.f32 %v2824_v60, %v2707_v15  ;;  %v2888_v38 = vadd.f32 %v5600_v0, %v2865_v44  ;;  %v4595_v10 = vld [vmem:[%s5817_s8 + $0x10] sm:$0xff]  }
 0x3eb   : > { %v4293_v37 = vpop.f32.mrf.mxu0 }
 0x3ec   : > { %v2913_v13 = vmax.f32 %v2899_v16, %v2901_v54  ;;  %v2886_v22 = vadd.f32 %v5600_v0, %v2863_v9  ;;  %v2866_v58 = vadd.f32 %v4293_v37, %v2710_v47  ;;  %v2904_v3 = vmax.f32 %v2888_v38, 0.0  ;;  %v4596_v47 = vld [vmem:[%s5817_s8 + $0x8] sm:$0xff]  }
 0x3ed   : > { %v2827_v8 = vpop.f32.mrf.mxu0  ;;  %v4598_v16 = vld [vmem:[%s5818_s9 + $0x28] sm:$0xff]   ;;  %v4647_v9 = vmov 0.0  }
 0x3ee   : > { %v2919_v29 = vpack.c.bf16 %v2913_v13, %v2912_v36  ;;  %v2889_v25 = vadd.f32 %v5600_v0, %v2866_v58  ;;  %v2864_v42 = vadd.f32 %v2827_v8, %v2708_v52  ;;  %v2902_v45 = vmax.f32 %v2886_v22, 0.0  ;;  %4338 = vmatprep.subr.bf16.mxu0 %v4647_v9  ;;  %4344 = vmatprep.mubr.msk.bf16.mxu0 %vm4648_vm6, %v4647_v9 }
 0x3ef   : > { %v4296_v61 = vpop.f32.mrf.mxu0  ;;  %4339 = vmatpush3.bf16.msra.mxu0 %v4598_v16 }
 0x3f0   : > { %v2887_v21 = vadd.f32 %v5600_v0, %v2864_v42  ;;  %4311 = vmatmul.mubr.msk.bf16.vlgmr.msra.gmra.mxu1 %vm2970_vm5, %v2919_v29  ;;  %v2905_v59 = vmax.f32 %v2889_v25, 0.0  ;;  %v2869_v19 = vadd.f32 %v4296_v61, %v2713_v46  ;;  %v2914_v2 = vmax.f32 %v2902_v45, %v2904_v3  ;;  %4340 = vmatprep.subr.bf16.mxu0 %v4647_v9 }
 0x3f1   : > { %v2840_v48 = vpop.f32.mrf.mxu0  ;;  %4319 = vmatpush3.bf16.msra.mxu1 %v5837_v18 }
 0x3f2   : > { %v2903_v20 = vmax.f32 %v2887_v21, 0.0  ;;  %v2867_v27 = vadd.f32 %v2840_v48, %v2711_v24  ;;  %4320 = vmatprep.subr.bf16.mxu1 %v4593_v57  ;;  %v2892_v63 = vadd.f32 %v5600_v0, %v2869_v19  ;;  %v4606_v21 = vld [vmem:[%s5818_s9 + $0x38] sm:$0xff]   ;;  %v4607_v24 = vld [vmem:[%s5818_s9 + $0x50] sm:$0xff]  }
 0x3f3   : > { %v4297_v50 = vpop.f32.mrf.mxu0  ;;  %v4608_v48 = vld [vmem:[%s5818_s9 + $0x30] sm:$0xff]  }
 0x3f4   : > { %v2915_v62 = vmax.f32 %v2903_v20, %v2905_v59  ;;  %v2890_v43 = vadd.f32 %v5600_v0, %v2867_v27  ;;  %v2870_v31 = vadd.f32 %v4297_v50, %v2714_v32  ;;  %v2908_v53 = vmax.f32 %v2892_v63, 0.0  ;;  %v4609_v59 = vld [vmem:[%s5818_s9 + $0x48] sm:$0xff]   ;;  %v4618_v63 = vld [vmem:[%s5822_s13 + $0x18] sm:$0x3f]  }
 0x3f5   : > { %v2843_v28 = vpop.f32.mrf.mxu0  ;;  %4321 = vmatpush3.bf16.msra.mxu1 %v4593_v57 }
 0x3f6   : > { %v2920_v30 = vpack.c.bf16 %v2915_v62, %v2914_v2  ;;  %v2893_v23 = vadd.f32 %v5600_v0, %v2870_v31  ;;  %v2868_v4 = vadd.f32 %v2843_v28, %v2712_v35  ;;  %4322 = vmatprep.subr.bf16.mxu1 %v4594_v1  ;;  %v2906_v15 = vmax.f32 %v2890_v43, 0.0  ;;  %v4611_v35 = vld [vmem:[%s5820_s11 + $0x30] sm:$0xff]   ;;  %v4612_v2 = vld [vmem:[%s5820_s11 + $0x28] sm:$0xff]   ;;  %v4613_v62 = vld [vmem:[%s5820_s11 + $0x20] sm:$0xff]  }
 0x3f7   : > { %v4614_v43 = vld [vmem:[%s5820_s11 + $0x18] sm:$0xff]   ;;  %v4615_v31 = vld [vmem:[%s5820_s11 + $0x10] sm:$0xff]   ;;  %v4616_v28 = vld [vmem:[%s5820_s11 + $0x8] sm:$0xff]  }
 0x3f8   : > { %v2891_v33 = vadd.f32 %v5600_v0, %v2868_v4  ;;  %4314 = vmatprep.mubr.msk.bf16.mxu1 %vm2970_vm5, %v2920_v30  ;;  %v2909_v44 = vmax.f32 %v2893_v23, 0.0  ;;  %v2916_v26 = vmax.f32 %v2906_v15, %v2908_v53  ;;  %v4597_v0 = vld [vmem:[%s5817_s8] sm:$0xff]   ;;  %v3626_v23 = vsel %vm1178_vm1, %v4618_v63, 0 }
 0x3f9   : > { %4323 = vmatpush3.bf16.msra.mxu1 %v4594_v1  ;;  %v3537_v1 = vsel %vm2172_vm3, %v4610_v51, 0 }
 0x3fa   : > { %v2907_v60 = vmax.f32 %v2891_v33, 0.0  ;;  %4324 = vmatprep.subr.bf16.mxu1 %v4595_v10 }
 0x3fc   : > { %v2917_v56 = vmax.f32 %v2907_v60, %v2909_v44 }
 0x3fd   : > { %4325 = vmatpush3.bf16.msra.mxu1 %v4595_v10 }
 0x3fe   : > { %v2921_v54 = vpack.c.bf16 %v2917_v56, %v2916_v26  ;;  %4326 = vmatprep.subr.bf16.mxu1 %v4596_v47 }
 0x400   : > { %4315 = vmatmul.mubr.msk.bf16.gmra.mxu1 %vm2970_vm5, %v2921_v54 }
 0x401   : > { %4327 = vmatpush3.bf16.msra.mxu1 %v4596_v47  ;;  %4330 = vmatprep.mubr.msk.bf16.mxu1 %vm2970_vm5, %v5619_v5  ;;  %v4599_v5 = vld [vmem:[%s5818_s9 + $0x20] sm:$0xff]  }
 0x402   : > { %4328 = vmatprep.subr.bf16.mxu1 %v4597_v0  ;;  %4341 = vmatpush3.bf16.msra.mxu0 %v4599_v5 }
 0x403   : > { %4342 = vmatprep.subr.bf16.mxu0 %v4647_v9 }
 0x405   : > { %4329 = vmatpush3.bf16.msra.mxu1 %v4597_v0 }
 0x406   : > { %4348 = vmatprep.subr.bf16.mxu1 %v4647_v9  ;;  %4343 = vmatpush3.bf16.msra.mxu0 %v4601_v39  ;;  %v4032_v39 = vld [vmem:[%s5819_s10] ss:$0 sm:$0xff] }
 0x407   : > { %4358 = vmatprep.subr.bf16.mxu0 %v4647_v9 }
 0x408   : > { %4331 = vmatmul.mubr.msk.bf16.vlgmr.msra.gmra.mxu1 %vm2970_vm5, %v2919_v29 }
 0x409   : > { %4334 = vmatprep.mubr.msk.bf16.mxu1 %vm2970_vm5, %v2920_v30  ;;  %4349 = vmatpush3.bf16.msra.mxu1 %v4600_v17  ;;  %v4617_v30 = vld [vmem:[%s5820_s11] sm:$0xff]  }
 0x40a   : > { %4350 = vmatprep.subr.bf16.mxu1 %v4647_v9 }
 0x40d   : > { %4351 = vmatpush3.bf16.msra.mxu1 %v4602_v11 }
 0x40e   : > { %4352 = vmatprep.subr.bf16.mxu1 %v4647_v9 }
 0x410   : > { %4335 = vmatmul.mubr.msk.bf16.gmra.mxu1 %vm2970_vm5, %v2921_v54 }
 0x411   : > { %4353 = vmatpush3.bf16.msra.mxu1 %v4603_v41  ;;  %4354 = vmatprep.mubr.msk.bf16.mxu1 %vm4648_vm6, %v4647_v9 }
 0x412   : > { %4368 = vmatprep.subr.bf16.mxu1 %v4647_v9 }
 0x4b0   : > { %v4312_v34 = vpop.f32.mrf.mxu1 }
 0x4b2   : > { %v3017_v12 = vpop.f32.mrf.mxu1 }
 0x4b4   : > { %v4313_v37 = vpop.f32.mrf.mxu1 }
 0x4b6   : > { %v3020_v52 = vpop.f32.mrf.mxu1 }
 0x4c0   : > { %v4316_v36 = vpop.f32.mrf.mxu1 }
 0x4c2   : > { %v3033_v13 = vpop.f32.mrf.mxu1 }
 0x4c4   : > { %v4317_v22 = vpop.f32.mrf.mxu1 }
 0x4c6   : > { %v3036_v58 = vpop.f32.mrf.mxu1 }
 0x4c8   : > { %v4332_v49 = vpop.f32.mrf.mxu1 }
 0x4c9   : > { %v3163_v55 = vmax.f32 %v4312_v34, %v4332_v49 }
 0x4ca   : > { %v3130_v6 = vpop.f32.mrf.mxu1 }
 0x4cb   : > { %v3161_v29 = vmax.f32 %v3017_v12, %v3130_v6 }
 0x4cc   : > { %v4333_v14 = vpop.f32.mrf.mxu1 }
 0x4cd   : > { %v3164_v38 = vmax.f32 %v4313_v37, %v4333_v14  ;;  %v4619_v14 = vld [vmem:[%s5822_s13 + $0x10] sm:$0xff]  }
 0x4ce   : > { %v3133_v8 = vpop.f32.mrf.mxu1 }
 0x4cf   : > { %v3170_v25 = vpack.c.bf16 %v3164_v38, %v3163_v55  ;;  %v3162_v42 = vmax.f32 %v3020_v52, %v3133_v8  ;;  %v4620_v55 = vld [vmem:[%s5822_s13 + $0x8] sm:$0xff]   ;;  %v4621_v38 = vld [vmem:[%s5822_s13] sm:$0xff]  }
 0x4d0   : > { %v4336_v57 = vpop.f32.mrf.mxu1  ;;  %v4033_v8 = vld [vmem:[%s5821_s12] ss:$0 sm:$0xff] }
 0x4d1   : > { %v3169_v61 = vpack.c.bf16 %v3162_v42, %v3161_v29  ;;  %4345 = vmatmul.mubr.msk.bf16.vlgmr.msra.gmra.mxu0 %vm3204_vm7, %v3170_v25  ;;  %v3167_v27 = vmax.f32 %v4316_v36, %v4336_v57 }
 0x4d2   : > { %4359 = vmatpush3.bf16.msra.mxu0 %v4604_v7  ;;  %v3146_v45 = vpop.f32.mrf.mxu1  ;;  %4364 = vmatprep.mubr.msk.bf16.mxu0 %vm4648_vm6, %v4647_v9 }
 0x4d3   : > { %4355 = vmatmul.mubr.msk.bf16.vlgmr.msra.gmra.mxu1 %vm3204_vm7, %v3169_v61  ;;  %4360 = vmatprep.subr.bf16.mxu0 %v4647_v9  ;;  %v3165_v18 = vmax.f32 %v3033_v13, %v3146_v45 }
 0x4d4   : > { %4369 = vmatpush3.bf16.msra.mxu1 %v4605_v40  ;;  %v4337_v46 = vpop.f32.mrf.mxu1  ;;  %4374 = vmatprep.mubr.msk.bf16.mxu1 %vm4648_vm6, %v4647_v9 }
 0x4d5   : > { %4370 = vmatprep.subr.bf16.mxu1 %v4647_v9  ;;  %v3168_v20 = vmax.f32 %v4317_v22, %v4337_v46 }
 0x4d6   : > { %4361 = vmatpush3.bf16.msra.mxu0 %v4606_v21  ;;  %v3149_v3 = vpop.f32.mrf.mxu1 }
 0x4d7   : > { %v3166_v32 = vmax.f32 %v3036_v58, %v3149_v3  ;;  %4362 = vmatprep.subr.bf16.mxu0 %v4647_v9  ;;  %v3172_v50 = vpack.c.bf16 %v3168_v20, %v3167_v27 }
 0x4d8   : > { %4371 = vmatpush3.bf16.msra.mxu1 %v4607_v24 }
 0x4d9   : > { %v3171_v19 = vpack.c.bf16 %v3166_v32, %v3165_v18  ;;  %4372 = vmatprep.subr.bf16.mxu1 %v4647_v9 }
 0x4da   : > { %4363 = vmatpush3.bf16.msra.mxu0 %v4608_v48 }
 0x4db   : > { %4378 = vmatprep.subr.bf16.mxu0 %v4647_v9 }
 0x4dc   : > { %4373 = vmatpush3.bf16.msra.mxu1 %v4609_v59 }
 0x4dd   : > { %4365 = vmatmul.mubr.msk.bf16.vlgmr.msra.gmra.mxu0 %vm3204_vm7, %v3171_v19  ;;  %4398 = vmatprep.subr.bf16.mxu1 %v4647_v9 }
 0x4de   : > { %4379 = vmatpush3.bf16.msra.mxu0 %v3537_v1  ;;  %4394 = vmatprep.mubr.msk.bf16.mxu0 %vm4648_vm6, %v4647_v9 }
 0x4df   : > { %4375 = vmatmul.mubr.msk.bf16.vlgmr.msra.gmra.mxu1 %vm3204_vm7, %v3172_v50  ;;  %4380 = vmatprep.subr.bf16.mxu0 %v4647_v9 }
 0x4e0   : > { %4406 = vmatprep.mubr.msk.bf16.mxu1 %vm4648_vm6, %v4647_v9  ;;  %4399 = vmatpush3.bf16.msra.mxu1 %v3626_v23 }
 0x4e1   : > { %4400 = vmatprep.subr.bf16.mxu1 %v4647_v9 }
 0x4e2   : > { %4381 = vmatpush3.bf16.msra.mxu0 %v4611_v35 }
 0x4e3   : > { %4382 = vmatprep.subr.bf16.mxu0 %v4647_v9 }
 0x4e4   : > { %4401 = vmatpush3.bf16.msra.mxu1 %v4619_v14 }
 0x4e5   : > { %4402 = vmatprep.subr.bf16.mxu1 %v4647_v9 }
 0x4e6   : > { %4383 = vmatpush3.bf16.msra.mxu0 %v4612_v2 }
 0x4e7   : > { %4384 = vmatprep.subr.bf16.mxu0 %v4647_v9 }
 0x4e8   : > { %4403 = vmatpush3.bf16.msra.mxu1 %v4620_v55 }
 0x4e9   : > { %4404 = vmatprep.subr.bf16.mxu1 %v4647_v9 }
 0x4ea   : > { %4385 = vmatpush3.bf16.msra.mxu0 %v4613_v62 }
 0x4eb   : > { %4386 = vmatprep.subr.bf16.mxu0 %v4647_v9 }
 0x4ec   : > { %4405 = vmatpush3.bf16.msra.mxu1 %v4621_v38 }
 0x4ee   : > { %4387 = vmatpush3.bf16.msra.mxu0 %v4614_v43 }
 0x4ef   : > { %4388 = vmatprep.subr.bf16.mxu0 %v4647_v9 }
 0x4f2   : > { %4389 = vmatpush3.bf16.msra.mxu0 %v4615_v31 }
 0x4f3   : > { %4390 = vmatprep.subr.bf16.mxu0 %v4647_v9 }
 0x4f6   : > { %4391 = vmatpush3.bf16.msra.mxu0 %v4616_v28 }
 0x4f7   : > { %4392 = vmatprep.subr.bf16.mxu0 %v4647_v9  ;;  %v4043_v9 = vld [vmem:[%s5823_s14] ss:$0 sm:$0xff] }
 0x4fa   : > { %4393 = vmatpush3.bf16.msra.mxu0 %v4617_v30 }
 0x591   : > { %v3242_v4 = vpop.f32.mrf.mxu0 }
 0x593   : > { %v4346_v10 = vpop.f32.mrf.mxu0  ;;  %v3304_v15 = vpop.f32.mrf.mxu1 }
 0x594   : > { %v3305_v26 = vadd.f32 %v3304_v15, %v3242_v4 }
 0x595   : > { %v3245_v33 = vpop.f32.mrf.mxu0  ;;  %v4356_v53 = vpop.f32.mrf.mxu1 }
 0x597   : > { %v4347_v44 = vpop.f32.mrf.mxu0  ;;  %v3307_v60 = vpop.f32.mrf.mxu1 }
 0x598   : > { %v3308_v5 = vadd.f32 %v3307_v60, %v3245_v33 }
 0x599   : > { %v4357_v47 = vpop.f32.mrf.mxu1 }
 0x59d   : > { %v3373_v56 = vpop.f32.mrf.mxu0 }
 0x59e   : > { %v3380_v54 = vadd.f32 %v3373_v56, %v3305_v26 }
 0x59f   : > { %v4366_v0 = vpop.f32.mrf.mxu0  ;;  %v3444_v16 = vpop.f32.mrf.mxu1 }
 0x5a0   : > { %v3451_v17 = vadd.f32 %v3444_v16, %v3380_v54 }
 0x5a1   : > { %v3376_v11 = vpop.f32.mrf.mxu0  ;;  %v4376_v41 = vpop.f32.mrf.mxu1 }
 0x5a2   : > { %v3381_v34 = vadd.f32 %v3376_v11, %v3308_v5  ;;  %v3460_v52 = vadd.f32 %v4032_v39, %v3451_v17 }
 0x5a3   : > { %v4367_v12 = vpop.f32.mrf.mxu0  ;;  %v3447_v37 = vpop.f32.mrf.mxu1 }
 0x5a4   : > { %v3452_v36 = vadd.f32 %v3447_v37, %v3381_v34  ;;  %v3462_v58 = vmax.f32 %v3460_v52, 0.0 }
 0x5a5   : > { %v4377_v13 = vpop.f32.mrf.mxu1 }
 0x5a6   : > { %v3461_v22 = vadd.f32 %v4032_v39, %v3452_v36 }
 0x5a8   : > { %v3463_v49 = vmax.f32 %v3461_v22, 0.0 }
 0x5aa   : > { %v3464_v6 = vpack.c.bf16 %v3463_v49, %v3462_v58 }
 0x5ac   : > { %4395 = vmatmul.mubr.msk.bf16.vlgmr.msra.gmra.mxu0 %vm3532_vm8, %v3464_v6 }
 0x66c   : > { %v3573_v7 = vpop.f32.mrf.mxu0 }
 0x66d   : > { %v3574_v25 = vadd.f32 %v4033_v8, %v3573_v7 }
 0x66e   : > { %v4396_v29 = vpop.f32.mrf.mxu0 }
 0x66f   : > { %v3580_v61 = vmax.f32 %v3574_v25, 0.0 }
 0x670   : > { %v3576_v42 = vpop.f32.mrf.mxu0 }
 0x671   : > { %v3577_v57 = vadd.f32 %v4033_v8, %v3576_v42 }
 0x672   : > { %v4397_v40 = vpop.f32.mrf.mxu0 }
 0x673   : > { %v3581_v45 = vmax.f32 %v3577_v57, 0.0 }
 0x675   : > { %v3582_v21 = vpack.c.bf16 %v3581_v45, %v3580_v61 }
 0x677   : > { %4407 = vmatmul.mubr.msk.bf16.vlgmr.msra.gmra.mxu1 %vm3621_vm9, %v3582_v21 }
 0x737   : > { %v3662_v46 = vpop.f32.mrf.mxu1 }
 0x738   : > { %v3663_v24 = vadd.f32 %v4043_v9, %v3662_v46 }
 0x739   : > { %v4408_v3 = vpop.f32.mrf.mxu1 }
 0x73a   : > { %3669 = vst [vmem:[%s720_s16] sm:$0xff] %v3663_v24 }
 0x73b   : > { %v3665_v48 = vpop.f32.mrf.mxu1 }
 0x73c   : > { %v3666_v18 = vadd.f32 %v4043_v9, %v3665_v48 }
 0x73d   : > { %v4409_v32 = vpop.f32.mrf.mxu1 }
 0x73e   : > { %3670 = vst [vmem:[%s720_s16 + $0x8] sm:$0xff] %v3666_v18 }
 0x73f PF: > { %p22_p9 = scmp.ge.s32.totalorder %s4746_s22, 4   ;;  %s5839_s18 = smov %s4640_s19 }
 0x740   : > { %s5840_s19 = smov %s4755_s25  ;;  %s5841_s20 = smov %s4746_s22 }
 0x741   :  { %24 = sbr.rel (!%p22_p9) target bundleno = 2 (0x2), region = 160 }

</bundles_post_ra>
